<compile_context>
chip_gen: v7x
topology: tpu7x:2x2x1
jax: 0.10.0
libtpu: 0.0.40
codegen_flags: <defaults>
</compile_context>

<pallas_src>
import functools
import math

import jax
import jax.numpy as jnp
import numpy as np
from jax import lax
from jax.experimental import pallas as pl
from jax.experimental.pallas import tpu as pltpu

LN_EPS = 1e-5  # nn.LayerNorm default eps


def _layernorm(x, gamma, beta, eps=LN_EPS):
    x = x.astype(jnp.float32)
    mu = jnp.mean(x, axis=-1, keepdims=True)
    var = jnp.mean(jnp.square(x - mu), axis=-1, keepdims=True)
    return (x - mu) * lax.rsqrt(var + eps) * gamma + beta


def _vmem_capacity_bytes():
    # Generation-aware VMEM: v5e/v6e 128 MiB, v7x 64 MiB per TensorCore.
    try:
        return int(pltpu.get_tpu_info().vmem_capacity_bytes)
    except Exception:
        return 64 * 2 ** 20  # conservative fallback (v7x per-core figure)


def attentional_pooler_kernel(
    x_ref, qpbd_ref, mask_ref, lnk_g_ref, lnk_b_ref,
    wkv_t_ref, bkv_ref, wo_t_ref, bo_ref,
    out_ref, *, n_head: int):
    tb, L, C = x_ref.shape
    HQ, D = qpbd_ref.shape                     # HQ = n_head * n_queries
    n_q = HQ // n_head
    in_dtype = x_ref.dtype

    # ln_k(x): statistics in f32, result back to the compute dtype for the MXU.
    x = x_ref[...].astype(jnp.float32)                                  # (tb, L, C)
    mu = jnp.mean(x, axis=-1, keepdims=True)
    var = jnp.mean(jnp.square(x - mu), axis=-1, keepdims=True)
    xn = ((x - mu) * lax.rsqrt(var + LN_EPS) * lnk_g_ref[0]
          + lnk_b_ref[0]).astype(in_dtype)
    xn2 = xn.reshape(tb * L, C)

    # Fused K/V projection: one (tb*L, C) @ (C, 2D) MXU pass; split at lane boundary D.
    kvp = (jnp.dot(xn2, wkv_t_ref[...], preferred_element_type=jnp.float32)
           + bkv_ref[0]).astype(in_dtype)                               # (tb*L, 2D)
    kp = kvp[:, :D].reshape(tb, L, D)
    vp = kvp[:, D:].reshape(tb, L, D)

    # Block-diagonal query matmul: qpbd is ln_q'd, projected, 1/sqrt(hd)-scaled and zero
    # outside each head's hd block, so a single full-K = D contraction yields every
    # head's scores at once (row h*n_q + q of s is head h / query q).
    q_b = jnp.broadcast_to(qpbd_ref[...], (tb, HQ, D))
    s = jnp.einsum('bqd,bld->bql', q_b, kp,
                   preferred_element_type=jnp.float32)                  # (tb, HQ, L)

    # One softmax over keys for all heads; the divide becomes an EUP reciprocal that is
    # applied after PV (normalization commutes with the linear PV contraction).
    s = s - jnp.max(s, axis=-1, keepdims=True)
    p = jnp.exp(s)
    inv = pl.reciprocal(jnp.sum(p, axis=-1, keepdims=True), approx=True)  # (tb, HQ, 1)

    # PV at full D width (no per-head hd=32 lane slices) ...
    ctx_all = jnp.einsum('bql,bld->bqd', p.astype(in_dtype), vp,
                         preferred_element_type=jnp.float32)            # (tb, HQ, D)
    ctx_all = ctx_all * inv
    # ... then the block-diag mask zeroes the off-head columns and the head-sum folds the
    # (n_head, n_q) rows back to n_q rows with n_head cheap VPU adds (one live accumulator).
    ctx_m = ctx_all * mask_ref[...]
    ctx = ctx_m[:, 0:n_q, :]
    for h in range(1, n_head):
        ctx = ctx + ctx_m[:, h * n_q:(h + 1) * n_q, :]
    ctx = ctx.astype(in_dtype)                                          # (tb, n_q, D)

    # Single out-projection with full-width contraction K = d_model; lane-dense store.
    out = (jnp.dot(ctx.reshape(tb * n_q, D), wo_t_ref[...],
                   preferred_element_type=jnp.float32) + bo_ref[0])
    out_ref[...] = out.reshape(tb, n_q, D).astype(out_ref.dtype)
    # TODO(synk): key_padding_mask (attn_mask) path not implemented; mask=None only.


def attentional_pooler(x, params, n_head, tb=None, compute_dtype=None):
    N, L, C = x.shape
    n_q, D = params["query"].shape
    hd = D // n_head
    HQ = n_head * n_q
    f32 = jnp.float32

    # Optional bf16 MXU path (cast x + projection weights); accumulation stays f32.
    cdt = jnp.dtype(compute_dtype) if compute_dtype is not None else x.dtype
    x = x.astype(cdt)
    itemsize = jnp.dtype(cdt).itemsize

    # ---- hoisted query-side compute (independent of x and of the batch index) ----
    qn = _layernorm(params["query"], params["lnq_g"][0], params["lnq_b"][0])
    qp = (qn @ params["wq"].T.astype(f32) + params["bq"][0]) * (1.0 / math.sqrt(hd))
    # Block-diagonal layout (HQ, D): row h*n_q + q keeps only head h's hd-wide slice.
    head_of_col = jnp.arange(D, dtype=jnp.int32) // hd
    head_of_row = jnp.arange(HQ, dtype=jnp.int32) // n_q
    head_mask = (head_of_row[:, None] == head_of_col[None, :]).astype(f32)    # (HQ, D)
    qp_bd = (jnp.tile(qp, (n_head, 1)) * head_mask).astype(cdt)               # (HQ, D)

    # ---- fused + pre-transposed K/V weights: one (C, 2D) in-kernel matmul ----
    wkv_t = jnp.concatenate([params["wk"].T, params["wv"].T], axis=1).astype(cdt)  # (C, 2D)
    bkv = jnp.concatenate([params["bk"], params["bv"]], axis=-1)                    # (1, 2D)
    wo_t = jnp.transpose(params["wo"]).astype(cdt)                                  # (D, D)

    ordered = [qp_bd, head_mask, params["lnk_g"], params["lnk_b"],
               wkv_t, bkv, wo_t, params["bo"]]
    weight_bytes = sum(int(a.size) * a.dtype.itemsize for a in ordered)

    # Per-batch-row VMEM footprint: double-buffered x/out blocks + f32 temporaries.
    per_row = (2 * L * C * itemsize + 2 * n_q * D * itemsize
               + L * (C + 2 * D) * 4                 # LN result + fused K/V projection
               + HQ * (L + D) * 4                    # scores + full-width PV context
               + n_q * D * 4)                        # head-combined context

    vmem_cap = _vmem_capacity_bytes()
    if tb is None:
        budget = max(per_row, vmem_cap // 2 - 2 * weight_bytes)
        tb_vmem = max(1, budget // per_row)
        tb_mxu = pl.cdiv(512, L)      # target M = tb*L in [256, 512+] for the 256-wide MXU
        # Keep >= 2 grid steps so the BlockSpec pipeline can overlap DMA with compute
        # (on v7x each of the 2 TensorCores then still gets work; small N => smaller tb).
        tb = int(max(1, min(tb_mxu, tb_vmem, pl.cdiv(N, 2))))
    grid = (pl.cdiv(N, tb),)
    # No wrapper-side jnp.pad: rows are independent, so the partial last block's OOB
    # reads cannot contaminate valid rows and its OOB writes are masked by Pallas.

    def const_spec(arr):              # full-array block, fixed block index
        return pl.BlockSpec(arr.shape, lambda g, _nd=arr.ndim: (0,) * _nd)
    # NOTE: constant blocks could use pipeline_mode=pl.Buffered(1) to skip their
    # double-buffer (~weight_bytes of VMEM); omitted for lowering-compat safety.

    cost = pl.CostEstimate(
        flops=int(N * (4 * L * C * D + 4 * L * HQ * D + 2 * n_q * D * D)),
        transcendentals=int(N * HQ * (L + 1)),
        bytes_accessed=int(N * L * C * itemsize + N * n_q * D * itemsize + weight_bytes),
    )
    block_bytes = 2 * weight_bytes + per_row * tb
    vmem_limit = int(min(max(16 * 2 ** 20, 2 * block_bytes), (vmem_cap * 3) // 4))

    kernel = functools.partial(attentional_pooler_kernel, n_head=n_head)
    out = pl.pallas_call(
        kernel,
        out_shape=jax.ShapeDtypeStruct((N, n_q, D), cdt),
        grid=grid,
        in_specs=[pl.BlockSpec((tb, L, C), lambda g: (g, 0, 0))]
                 + [const_spec(a) for a in ordered],
        out_specs=pl.BlockSpec((tb, n_q, D), lambda g: (g, 0, 0)),
        compiler_params=pltpu.CompilerParams(
            dimension_semantics=("parallel",),
            vmem_limit_bytes=vmem_limit),
        cost_estimate=cost,
    )(x, *ordered)
    return out


def reference(x, params, n_head):
    """Pure-JAX reference mirroring nn.MultiheadAttention(kdim=vdim=context_dim)."""
    N, L, C = x.shape
    n_q, D = params["query"].shape
    hd = D // n_head
    xn = _layernorm(x, params["lnk_g"][0], params["lnk_b"][0])
    qn = _layernorm(params["query"], params["lnq_g"][0], params["lnq_b"][0])
    qp = qn @ params["wq"].T + params["bq"][0]
    kp = xn @ params["wk"].T + params["bk"][0]
    vp = xn @ params["wv"].T + params["bv"][0]
    qh = (qp / math.sqrt(hd)).reshape(n_q, n_head, hd)
    kh = kp.reshape(N, L, n_head, hd)
    vh = vp.reshape(N, L, n_head, hd)
    s = jnp.einsum("qhd,nlhd->nhql", qh, kh)
    p = jax.nn.softmax(s, axis=-1)
    ctx = jnp.einsum("nhql,nlhd->nqhd", p, vh).reshape(N, n_q, D)
    return (ctx @ params["wo"].T + params["bo"][0]).astype(x.dtype)


if __name__ == "__main__":
    # Small shapes consistent with the module's forward; d_model chosen lane-dense (128).
    # N=5 deliberately exercises the partial last block (no wrapper padding).
    N, L = 5, 16                         # batch, sequence length of context x
    d_model, context_dim = 128, 192
    n_head, n_queries = 4, 8

    key = jax.random.PRNGKey(0)
    ks = jax.random.split(key, 12)
    f32 = jnp.float32
    params = {
        "query": jax.random.normal(ks[0], (n_queries, d_model), f32),
        # LayerNorm params (stored as (1, dim) for clean TPU blocks)
        "lnk_g": 1.0 + 0.1 * jax.random.normal(ks[1], (1, context_dim), f32),
        "lnk_b": 0.1 * jax.random.normal(ks[2], (1, context_dim), f32),
        "lnq_g": 1.0 + 0.1 * jax.random.normal(ks[3], (1, d_model), f32),
        "lnq_b": 0.1 * jax.random.normal(ks[4], (1, d_model), f32),
        # MultiheadAttention separate q/k/v projection weights (kdim=vdim=context_dim)
        "wq": 0.05 * jax.random.normal(ks[5], (d_model, d_model), f32),
        "bq": 0.02 * jax.random.normal(ks[6], (1, d_model), f32),
        "wk": 0.05 * jax.random.normal(ks[7], (d_model, context_dim), f32),
        "bk": 0.02 * jax.random.normal(ks[8], (1, d_model), f32),
        "wv": 0.05 * jax.random.normal(ks[9], (d_model, context_dim), f32),
        "bv": 0.02 * jax.random.normal(ks[10], (1, d_model), f32),
        # out_proj
        "wo": 0.05 * jax.random.normal(ks[11], (d_model, d_model), f32),
        "bo": jnp.zeros((1, d_model), f32),
    }

    x = jax.random.normal(jax.random.PRNGKey(42), (N, L, context_dim), f32)

    out = jax.block_until_ready(attentional_pooler(x, params, n_head))
    ref = jax.block_until_ready(reference(x, params, n_head))

    assert out.shape == (N, n_queries, d_model)
    # Tolerance accounts for the EUP approximate reciprocal in the softmax normalization.
    np.testing.assert_allclose(np.asarray(out), np.asarray(ref), rtol=5e-3, atol=5e-3)

    print("KERNEL_OK")
</pallas_src>

<mosaic_0001>
module attributes {stable_mosaic.version = 11 : i64} {
  func.func @attentional_pooler_kernel(%arg0: i32, %arg1: memref<3x16x192xf32, #tpu.memory_space<vmem>>, %arg2: memref<32x128xf32, #tpu.memory_space<vmem>>, %arg3: memref<32x128xf32, #tpu.memory_space<vmem>>, %arg4: memref<1x192xf32, #tpu.memory_space<vmem>>, %arg5: memref<1x192xf32, #tpu.memory_space<vmem>>, %arg6: memref<192x256xf32, #tpu.memory_space<vmem>>, %arg7: memref<1x256xf32, #tpu.memory_space<vmem>>, %arg8: memref<128x128xf32, #tpu.memory_space<vmem>>, %arg9: memref<1x128xf32, #tpu.memory_space<vmem>>, %arg10: memref<3x8x128xf32, #tpu.memory_space<vmem>>) attributes {dimension_semantics = [#tpu.dimension_semantics<parallel>], iteration_bounds = array<i64: 2>, scalar_prefetch = 0 : i64, scratch_operands = 0 : i64, tpu.core_type = #tpu.core_type<tc>, window_params = [{transform_indices = @transform_0, window_bounds = array<i64: 3, 16, 192>}, {pipeline_mode = #tpu.pipeline_mode<synchronous>, transform_indices = @transform_1, window_bounds = array<i64: 32, 128>}, {pipeline_mode = #tpu.pipeline_mode<synchronous>, transform_indices = @transform_2, window_bounds = array<i64: 32, 128>}, {pipeline_mode = #tpu.pipeline_mode<synchronous>, transform_indices = @transform_3, window_bounds = array<i64: 1, 192>}, {pipeline_mode = #tpu.pipeline_mode<synchronous>, transform_indices = @transform_4, window_bounds = array<i64: 1, 192>}, {pipeline_mode = #tpu.pipeline_mode<synchronous>, transform_indices = @transform_5, window_bounds = array<i64: 192, 256>}, {pipeline_mode = #tpu.pipeline_mode<synchronous>, transform_indices = @transform_6, window_bounds = array<i64: 1, 256>}, {pipeline_mode = #tpu.pipeline_mode<synchronous>, transform_indices = @transform_7, window_bounds = array<i64: 128, 128>}, {pipeline_mode = #tpu.pipeline_mode<synchronous>, transform_indices = @transform_8, window_bounds = array<i64: 1, 128>}, {transform_indices = @transform_9, window_bounds = array<i64: 3, 8, 128>}]} {
    %c0 = arith.constant 0 : index
    %c0_0 = arith.constant 0 : index
    %c0_1 = arith.constant 0 : index
    %0 = vector.load %arg1[%c0, %c0_0, %c0_1] : memref<3x16x192xf32, #tpu.memory_space<vmem>>, vector<3x16x192xf32>
    %cst = arith.constant dense<0.000000e+00> : vector<3x16xf32>
    %1 = vector.multi_reduction <add>, %0, %cst [2] : vector<3x16x192xf32> to vector<3x16xf32>
    %2 = vector.shape_cast %1 : vector<3x16xf32> to vector<3x16x1xf32>
    %cst_2 = arith.constant 1.920000e+02 : f32
    %3 = vector.broadcast %cst_2 : f32 to vector<3x16x1xf32>
    %4 = arith.divf %2, %3 : vector<3x16x1xf32>
    %5 = vector.broadcast %4 : vector<3x16x1xf32> to vector<3x16x192xf32>
    %6 = arith.subf %0, %5 : vector<3x16x192xf32>
    %7 = arith.mulf %6, %6 : vector<3x16x192xf32>
    %cst_3 = arith.constant dense<0.000000e+00> : vector<3x16xf32>
    %8 = vector.multi_reduction <add>, %7, %cst_3 [2] : vector<3x16x192xf32> to vector<3x16xf32>
    %9 = vector.shape_cast %8 : vector<3x16xf32> to vector<3x16x1xf32>
    %cst_4 = arith.constant 1.920000e+02 : f32
    %10 = vector.broadcast %cst_4 : f32 to vector<3x16x1xf32>
    %11 = arith.divf %9, %10 : vector<3x16x1xf32>
    %12 = vector.broadcast %4 : vector<3x16x1xf32> to vector<3x16x192xf32>
    %13 = arith.subf %0, %12 : vector<3x16x192xf32>
    %cst_5 = arith.constant 9.99999974E-6 : f32
    %14 = vector.broadcast %cst_5 : f32 to vector<3x16x1xf32>
    %15 = arith.addf %11, %14 : vector<3x16x1xf32>
    %16 = math.rsqrt %15 : vector<3x16x1xf32>
    %17 = vector.broadcast %16 : vector<3x16x1xf32> to vector<3x16x192xf32>
    %18 = arith.mulf %13, %17 : vector<3x16x192xf32>
    %c0_6 = arith.constant 0 : index
    %c0_7 = arith.constant 0 : index
    %19 = vector.load %arg4[%c0_6, %c0_7] : memref<1x192xf32, #tpu.memory_space<vmem>>, vector<1x192xf32>
    %20 = vector.shape_cast %19 : vector<1x192xf32> to vector<192xf32>
    %21 = vector.shape_cast %20 : vector<192xf32> to vector<1x1x192xf32>
    %22 = vector.broadcast %21 : vector<1x1x192xf32> to vector<3x16x192xf32>
    %23 = arith.mulf %18, %22 : vector<3x16x192xf32>
    %c0_8 = arith.constant 0 : index
    %c0_9 = arith.constant 0 : index
    %24 = vector.load %arg5[%c0_8, %c0_9] : memref<1x192xf32, #tpu.memory_space<vmem>>, vector<1x192xf32>
    %25 = vector.shape_cast %24 : vector<1x192xf32> to vector<192xf32>
    %26 = vector.shape_cast %25 : vector<192xf32> to vector<1x1x192xf32>
    %27 = vector.broadcast %26 : vector<1x1x192xf32> to vector<3x16x192xf32>
    %28 = arith.addf %23, %27 : vector<3x16x192xf32>
    %29 = vector.shape_cast %28 : vector<3x16x192xf32> to vector<48x192xf32>
    %c0_10 = arith.constant 0 : index
    %c0_11 = arith.constant 0 : index
    %30 = vector.load %arg6[%c0_10, %c0_11] : memref<192x256xf32, #tpu.memory_space<vmem>>, vector<192x256xf32>
    %cst_12 = arith.constant dense<0.000000e+00> : vector<48x256xf32>
    %31 = tpu.matmul %29, %30, %cst_12 {dimension_numbers = #tpu.dot_dimension_numbers<[1], [0], [0], [1], [0, 0, 1, 1], [], []>} : vector<48x192xf32>, vector<192x256xf32>, vector<48x256xf32> -> vector<48x256xf32>
    %c0_13 = arith.constant 0 : index
    %c0_14 = arith.constant 0 : index
    %32 = vector.load %arg7[%c0_13, %c0_14] : memref<1x256xf32, #tpu.memory_space<vmem>>, vector<1x256xf32>
    %33 = vector.shape_cast %32 : vector<1x256xf32> to vector<256xf32>
    %34 = vector.shape_cast %33 : vector<256xf32> to vector<1x256xf32>
    %35 = vector.broadcast %34 : vector<1x256xf32> to vector<48x256xf32>
    %36 = arith.addf %31, %35 : vector<48x256xf32>
    %37 = vector.extract_strided_slice %36 {offsets = [0, 0], sizes = [48, 128], strides = [1, 1]} : vector<48x256xf32> to vector<48x128xf32>
    %38 = vector.shape_cast %37 : vector<48x128xf32> to vector<3x16x128xf32>
    %39 = vector.extract_strided_slice %36 {offsets = [0, 128], sizes = [48, 128], strides = [1, 1]} : vector<48x256xf32> to vector<48x128xf32>
    %40 = vector.shape_cast %39 : vector<48x128xf32> to vector<3x16x128xf32>
    %c0_15 = arith.constant 0 : index
    %c0_16 = arith.constant 0 : index
    %41 = vector.load %arg2[%c0_15, %c0_16] : memref<32x128xf32, #tpu.memory_space<vmem>>, vector<32x128xf32>
    %42 = vector.shape_cast %41 : vector<32x128xf32> to vector<1x32x128xf32>
    %43 = vector.broadcast %42 : vector<1x32x128xf32> to vector<3x32x128xf32>
    "tpu.trace_start"() <{level = 10 : i32, message = "bqd,bld->bql"}> : () -> ()
    %cst_17 = arith.constant dense<0.000000e+00> : vector<3x32x16xf32>
    %44 = tpu.matmul %43, %38, %cst_17 {dimension_numbers = #tpu.dot_dimension_numbers<[2], [2], [1], [1], [0, 0, 0, 1, 1, 1], [0], [0]>} : vector<3x32x128xf32>, vector<3x16x128xf32>, vector<3x32x16xf32> -> vector<3x32x16xf32>
    "tpu.trace_stop"() : () -> ()
    %cst_18 = arith.constant dense<0xFF800000> : vector<3x32xf32>
    %45 = vector.multi_reduction <maximumf>, %44, %cst_18 [2] : vector<3x32x16xf32> to vector<3x32xf32>
    %46 = vector.shape_cast %45 : vector<3x32xf32> to vector<3x32x1xf32>
    %47 = vector.broadcast %46 : vector<3x32x1xf32> to vector<3x32x16xf32>
    %48 = arith.subf %44, %47 : vector<3x32x16xf32>
    %49 = math.exp %48 : vector<3x32x16xf32>
    %cst_19 = arith.constant dense<0.000000e+00> : vector<3x32xf32>
    %50 = vector.multi_reduction <add>, %49, %cst_19 [2] : vector<3x32x16xf32> to vector<3x32xf32>
    %51 = vector.shape_cast %50 : vector<3x32xf32> to vector<3x32x1xf32>
    %52 = tpu.reciprocal %51 {approx = true} : vector<3x32x1xf32> -> vector<3x32x1xf32>
    "tpu.trace_start"() <{level = 10 : i32, message = "bql,bld->bqd"}> : () -> ()
    %cst_20 = arith.constant dense<0.000000e+00> : vector<3x32x128xf32>
    %53 = tpu.matmul %49, %40, %cst_20 {dimension_numbers = #tpu.dot_dimension_numbers<[2], [1], [1], [2], [0, 0, 0, 1, 1, 2], [0], [0]>} : vector<3x32x16xf32>, vector<3x16x128xf32>, vector<3x32x128xf32> -> vector<3x32x128xf32>
    "tpu.trace_stop"() : () -> ()
    %54 = vector.broadcast %52 : vector<3x32x1xf32> to vector<3x32x128xf32>
    %55 = arith.mulf %53, %54 : vector<3x32x128xf32>
    %c0_21 = arith.constant 0 : index
    %c0_22 = arith.constant 0 : index
    %56 = vector.load %arg3[%c0_21, %c0_22] : memref<32x128xf32, #tpu.memory_space<vmem>>, vector<32x128xf32>
    %57 = vector.shape_cast %56 : vector<32x128xf32> to vector<1x32x128xf32>
    %58 = vector.broadcast %57 : vector<1x32x128xf32> to vector<3x32x128xf32>
    %59 = arith.mulf %55, %58 : vector<3x32x128xf32>
    %60 = vector.extract_strided_slice %59 {offsets = [0, 0, 0], sizes = [3, 8, 128], strides = [1, 1, 1]} : vector<3x32x128xf32> to vector<3x8x128xf32>
    %61 = vector.extract_strided_slice %59 {offsets = [0, 8, 0], sizes = [3, 8, 128], strides = [1, 1, 1]} : vector<3x32x128xf32> to vector<3x8x128xf32>
    %62 = arith.addf %60, %61 : vector<3x8x128xf32>
    %63 = vector.extract_strided_slice %59 {offsets = [0, 16, 0], sizes = [3, 8, 128], strides = [1, 1, 1]} : vector<3x32x128xf32> to vector<3x8x128xf32>
    %64 = arith.addf %62, %63 : vector<3x8x128xf32>
    %65 = vector.extract_strided_slice %59 {offsets = [0, 24, 0], sizes = [3, 8, 128], strides = [1, 1, 1]} : vector<3x32x128xf32> to vector<3x8x128xf32>
    %66 = arith.addf %64, %65 : vector<3x8x128xf32>
    %67 = vector.shape_cast %66 : vector<3x8x128xf32> to vector<24x128xf32>
    %c0_23 = arith.constant 0 : index
    %c0_24 = arith.constant 0 : index
    %68 = vector.load %arg8[%c0_23, %c0_24] : memref<128x128xf32, #tpu.memory_space<vmem>>, vector<128x128xf32>
    %cst_25 = arith.constant dense<0.000000e+00> : vector<24x128xf32>
    %69 = tpu.matmul %67, %68, %cst_25 {dimension_numbers = #tpu.dot_dimension_numbers<[1], [0], [0], [1], [0, 0, 1, 1], [], []>} : vector<24x128xf32>, vector<128x128xf32>, vector<24x128xf32> -> vector<24x128xf32>
    %c0_26 = arith.constant 0 : index
    %c0_27 = arith.constant 0 : index
    %70 = vector.load %arg9[%c0_26, %c0_27] : memref<1x128xf32, #tpu.memory_space<vmem>>, vector<1x128xf32>
    %71 = vector.shape_cast %70 : vector<1x128xf32> to vector<128xf32>
    %72 = vector.shape_cast %71 : vector<128xf32> to vector<1x128xf32>
    %73 = vector.broadcast %72 : vector<1x128xf32> to vector<24x128xf32>
    %74 = arith.addf %69, %73 : vector<24x128xf32>
    %75 = vector.shape_cast %74 : vector<24x128xf32> to vector<3x8x128xf32>
    %c0_28 = arith.constant 0 : index
    %c0_29 = arith.constant 0 : index
    %c0_30 = arith.constant 0 : index
    %76 = vector.load %arg10[%c0_28, %c0_29, %c0_30] : memref<3x8x128xf32, #tpu.memory_space<vmem>>, vector<3x8x128xf32>
    tpu.vector_store %arg10[%c0_28, %c0_29, %c0_30], %75 {strides = array<i32>} : memref<3x8x128xf32, #tpu.memory_space<vmem>>, vector<3x8x128xf32>,
    return
  }
  func.func @transform_0(%arg0: i32) -> (i32, i32, i32) {
    %c0_i32 = arith.constant 0 : i32
    %c0_i32_0 = arith.constant 0 : i32
    %c0_i32_1 = arith.constant 0 : i32
    return %arg0, %c0_i32, %c0_i32_0 : i32, i32, i32
  }
  func.func @transform_1(%arg0: i32) -> (i32, i32) {
    %c0_i32 = arith.constant 0 : i32
    %c0_i32_0 = arith.constant 0 : i32
    %c0_i32_1 = arith.constant 0 : i32
    return %c0_i32, %c0_i32_0 : i32, i32
  }
  func.func @transform_2(%arg0: i32) -> (i32, i32) {
    %c0_i32 = arith.constant 0 : i32
    %c0_i32_0 = arith.constant 0 : i32
    %c0_i32_1 = arith.constant 0 : i32
    return %c0_i32, %c0_i32_0 : i32, i32
  }
  func.func @transform_3(%arg0: i32) -> (i32, i32) {
    %c0_i32 = arith.constant 0 : i32
    %c0_i32_0 = arith.constant 0 : i32
    %c0_i32_1 = arith.constant 0 : i32
    return %c0_i32, %c0_i32_0 : i32, i32
  }
  func.func @transform_4(%arg0: i32) -> (i32, i32) {
    %c0_i32 = arith.constant 0 : i32
    %c0_i32_0 = arith.constant 0 : i32
    %c0_i32_1 = arith.constant 0 : i32
    return %c0_i32, %c0_i32_0 : i32, i32
  }
  func.func @transform_5(%arg0: i32) -> (i32, i32) {
    %c0_i32 = arith.constant 0 : i32
    %c0_i32_0 = arith.constant 0 : i32
    %c0_i32_1 = arith.constant 0 : i32
    return %c0_i32, %c0_i32_0 : i32, i32
  }
  func.func @transform_6(%arg0: i32) -> (i32, i32) {
    %c0_i32 = arith.constant 0 : i32
    %c0_i32_0 = arith.constant 0 : i32
    %c0_i32_1 = arith.constant 0 : i32
    return %c0_i32, %c0_i32_0 : i32, i32
  }
  func.func @transform_7(%arg0: i32) -> (i32, i32) {
    %c0_i32 = arith.constant 0 : i32
    %c0_i32_0 = arith.constant 0 : i32
    %c0_i32_1 = arith.constant 0 : i32
    return %c0_i32, %c0_i32_0 : i32, i32
  }
  func.func @transform_8(%arg0: i32) -> (i32, i32) {
    %c0_i32 = arith.constant 0 : i32
    %c0_i32_0 = arith.constant 0 : i32
    %c0_i32_1 = arith.constant 0 : i32
    return %c0_i32, %c0_i32_0 : i32, i32
  }
  func.func @transform_9(%arg0: i32) -> (i32, i32, i32) {
    %c0_i32 = arith.constant 0 : i32
    %c0_i32_0 = arith.constant 0 : i32
    %c0_i32_1 = arith.constant 0 : i32
    return %arg0, %c0_i32, %c0_i32_0 : i32, i32, i32
  }
}

</mosaic_0001>

<bundles_post_ra>
// kernel: tpu_custom_call.1
= control target key start
LH: loop header
LB: loop body
LE: loop exit
PB: predicated region body
PF: predicated region fallthrough
CT: control target
= control target key end

     0   :  { %s2986_s0 = inlined_call_operand.hbm [shape: f32[5,16,192], index: 0, kind: input, shape index: {}]   ;;  %s2987_s1 = inlined_call_operand.hbm [shape: f32[32,128], index: 1, kind: input, shape index: {}]   ;;  %s2988_s2 = inlined_call_operand.hbm [shape: f32[32,128], index: 2, kind: input, shape index: {}]   ;;  %s2989_s3 = inlined_call_operand.vmem [shape: f32[1,192], index: 3, kind: input, shape index: {}]   ;;  %s2990_s4 = inlined_call_operand.vmem [shape: f32[1,192], index: 4, kind: input, shape index: {}]   ;;  %s2991_s5 = inlined_call_operand.hbm [shape: f32[192,256], index: 5, kind: input, shape index: {}]   ;;  %s2992_s6 = inlined_call_operand.vmem [shape: f32[1,256], index: 6, kind: input, shape index: {}]   ;;  %s2993_s7 = inlined_call_operand.hbm [shape: f32[128,128], index: 7, kind: input, shape index: {}]   ;;  %s2994_s8 = inlined_call_operand.vmem [shape: f32[1,128], index: 8, kind: input, shape index: {}]   ;;  %s2995_s9 = inlined_call_operand.hbm [shape: f32[5,8,128], index: 9, kind: output, shape index: {}]  }
   0x1   :  { %3009 = sst [smem:[#allocation21_spill]] %s2987_s1 }
   0x2   :  { %3010 = sst [smem:[#allocation22_spill]] %s2992_s6 }
   0x3   :  { %3011 = sst [smem:[#allocation23_spill]] %s2994_s8 }
   0x4   :  { %3012 = sst [smem:[#allocation24_spill]] %s2995_s9 }
   0x5   :  { %14 = vsyncpa [#allocation3], 0 }
   0x6   :  { %16 = vsyncpa [#allocation3 + $0x1], 0 }
   0x7   :  { %17 = vsyncpa [#allocation6], 0 }
   0x8   :  { %18 = vsyncpa [#allocation9], 0 }
   0x9   :  { %19 = vsyncpa [#allocation4], 0 }
   0xa   :  { %21 = vsyncpa [#allocation4 + $0x1], 0  ;;  %s2485_s30 = smov 0   ;;  %s2487_s10 = smov 0  }
   0xb   :  { %s2489_s11 = smov 0   ;;  %s2491_s12 = smov 0  }
   0xc LB: > { %3013 = sst [smem:[#allocation16_spill]] %s2404_s30  ;;  %s2506_s13 = sadd.s32 4294967295, %s2416_s12   ;;  %s2416_s12 = sphi %s2491_s12, %s3043_s12   ;;  %s2412_s11 = sphi %s2489_s11, %s3047_s11   ;;  %s2408_s10 = sphi %s2487_s10, %s3046_s10   ;;  %s2404_s30 = sphi %s2485_s30, %s3045_s30  }
   0xd   : > { %s1725_s14 = sadd.s32 4294967294, %s2416_s12   ;;  %s2510_s15 = sadd.s32 1, %s2416_s12  }
   0xe   : > { %3014 = sst [smem:[#allocation17_spill]] %s2510_s15  ;;  %s34_s16 = sadd.s32 1, %s2412_s11 }
   0xf   : > { %s31_s17 = ssub.s32 %s2416_s12, %s2510_s15  ;;  %p41_p0 = scmp.ne.s32.totalorder %s2412_s11, %s2408_s10 }
  0x10   : > { %p32_p1 = scmp.eq.s32.totalorder %s31_s17, 0  ;;  %p42_p2 = scmp.eq.s32.totalorder %s2416_s12, 0 }
  0x11   : > { %p47_p3 = scmp.ne.s32.totalorder %s2408_s10, %s2404_s30  ;;  %p2998_p4 = scmp.eq.s32.totalorder %s2506_s13, 0 }
  0x12   : > { %s2522_s18 = scalar_select %p32_p1, %s2412_s11, %s34_s16  }
  0x13   : > { %p2524_p5 = por %p42_p2, %p41_p0  ;;  %p2530_p6 = por %p2998_p4, %p47_p3 }
  0x14   : > { %3015 = sst [smem:[#allocation18_spill]] %s2522_s18  ;;  %p239_p7 = scmp.eq.s32.totalorder %s2506_s13, 1 }
  0x15   : > { %s3016_s19 = scalar_select %p2524_p5, 1, 0 }
  0x16   : > { %s3017_s20 = scalar_select %p2530_p6, 1, 0 }
  0x17   : > { %p245_p8 = scmp.eq.s32.totalorder %s1725_s14, 1  ;;  %p1726_p9 = scmp.ge.s32.totalorder %s2416_s12, 1 }
  0x18   : > { %p252_p10 = scmp.lt.s32.totalorder %s2416_s12, 3  ;;  %p2537_p11 = por %p239_p7, %p41_p0 }
  0x19   : > { %p2541_p12 = por %p245_p8, %p47_p3  ;;  %s2418_s24 = smov [#allocation5]  }
  0x1a   : > { %s3018_s21 = scalar_select %p2537_p11, 1, 0 }
  0x1b   : > { %s3020_s22 = scalar_select %p2541_p12, 1, 0 }
  0x1c   : > { %3019 = sst [smem:[#allocation19_spill]] %s3018_s21  ;;  %p2545_p13 = pnand %p1726_p9, %p252_p10 }
  0x1d   : > { %3021 = sst [smem:[#allocation20_spill]] %s3020_s22  ;;  %s264_s25 = sshll.u32 %s2418_s24, 4  ;;  %s265_s25 = int_to_ptr.vmem [resolvable:$true] %s264_s25 }
  0x1e   : > { %s3022_s23 = scalar_select %p2545_p13, 1, 0 }
  0x1f   : > { %p2069_p1 = pneg %p2545_p13  ;;  %s2419_s27 = smov [#allocation8]  }
  0x20   : > { %s296_s28 = sshll.u32 %s2419_s27, 4  ;;  %s3024_s1 = sld [smem:[#allocation21_spill]]  ;;  %s2557_s28 = int_to_ptr.vmem [resolvable:$true] %s296_s28 }
  0x21   : > { %p2553_p2 = pnand %p2069_p1, %p2998_p4 }
  0x23   : > { %p2567_p3 = pneg %p2553_p2 }
  0x26   : > { %s2202_s16 = scalar_lea.hbm %s3024_s1, 512 }
  0x27   : > { %p2203_p0 = scmp.ne.s32.totalorder %s3024_s1, %s2202_s16  ;;  %p2209_p9 = scmp.lt.u32.totalorder %s2202_s16, %s3024_s1 }
  0x29   : > { %p2205_p7 = pnand %p2567_p3, %p2203_p0 }
  0x2b   : > { %p2206_p8 = pneg %p2205_p7 }
  0x2d   : > { %p2211_p10 = pnand %p2209_p9, %p2206_p8 }
  0x2f   : > { %2214 = shalt.err (!%p2211_p10)
}
  0x30   : > { %s2215_s29 = scalar_lea.vmem %s265_s25, 512  ;;  %p2223_p11 = scmp.lt.s32.totalorder %s265_s25, %s265_s25 }
  0x31   : > { %p2216_p1 = scmp.ne.s32.totalorder %s265_s25, %s2215_s29  ;;  %p2224_p6 = scmp.lt.s32.totalorder %s2215_s29, %s2215_s29 }
  0x33   : > { %p2218_p4 = pnand %p2216_p1, %p2567_p3  ;;  %p2225_p13 = por %p2224_p6, %p2223_p11 }
  0x35   : > { %p2219_p12 = pneg %p2218_p4 }
  0x37   : > { %p2226_p5 = pnand %p2225_p13, %p2219_p12 }
  0x39   : > { %2229 = shalt.err (!%p2226_p5)
}
  0x3a   : > { %s3005_s18 = smov 128   ;;  %s3007_s14 = smov 8  }
  0x3b   : > { %2072 = dma.hbm_to_vmem [thread:$0]  (!%p2553_p2), %s3024_s1, 512, %s265_s25, [#allocation6], %s3005_s18, %s3005_s18, %s3007_s14  }
  0x3c   : > { %s2230_s22 = scalar_lea.hbm %s2991_s5, 6144 }
  0x3d   : > { %p2231_p4 = scmp.ne.s32.totalorder %s2991_s5, %s2230_s22  ;;  %p2237_p11 = scmp.lt.u32.totalorder %s2230_s22, %s2991_s5 }
  0x3f   : > { %p2233_p5 = pnand %p2231_p4, %p2567_p3 }
  0x41   : > { %p2234_p6 = pneg %p2233_p5 }
  0x43   : > { %p2239_p12 = pnand %p2237_p11, %p2234_p6 }
  0x45   : > { %2242 = shalt.err (!%p2239_p12)
}
  0x46   : > { %s2243_s25 = scalar_lea.vmem %s2557_s28, 6144  ;;  %p2251_p8 = scmp.lt.s32.totalorder %s2557_s28, %s2557_s28 }
  0x47   : > { %p2244_p13 = scmp.ne.s32.totalorder %s2557_s28, %s2243_s25  ;;  %p2252_p9 = scmp.lt.s32.totalorder %s2243_s25, %s2243_s25 }
  0x49   : > { %p2246_p0 = pnand %p2244_p13, %p2567_p3  ;;  %p2253_p10 = por %p2252_p9, %p2251_p8 }
  0x4b   : > { %p2247_p7 = pneg %p2246_p0 }
  0x4d   : > { %p2254_p1 = pnand %p2253_p10, %p2247_p7 }
  0x4f   : > { %2257 = shalt.err (!%p2254_p1)
}
  0x50   : > { %s2422_s30 = smov 256   ;;  %s2423_s9 = smov 16  }
  0x51   : > { %2078 = dma.hbm_to_vmem [thread:$0]  (!%p2553_p2), %s2991_s5, 6144, %s2557_s28, [#allocation9], %s2422_s30, %s2422_s30, %s2423_s9  }
  0x52   : > { %s2424_s15 = smov [#allocation7]   ;;  %s2425_s17 = smov [#allocation10]  }
  0x53   : > { %s277_s16 = sshll.u32 %s2424_s15, 4  ;;  %s312_s27 = sshll.u32 %s2425_s17, 4  ;;  %s278_s16 = int_to_ptr.vmem [resolvable:$true] %s277_s16  ;;  %s313_s27 = int_to_ptr.vmem [resolvable:$true] %s312_s27 }
  0x54   : > { %s2258_s18 = scalar_lea.hbm %s2988_s2, 512 }
  0x55   : > { %p2259_p4 = scmp.ne.s32.totalorder %s2988_s2, %s2258_s18  ;;  %p2265_p11 = scmp.lt.u32.totalorder %s2258_s18, %s2988_s2 }
  0x57   : > { %p2261_p5 = pnand %p2259_p4, %p2567_p3 }
  0x59   : > { %p2262_p6 = pneg %p2261_p5 }
  0x5b   : > { %p2267_p12 = pnand %p2265_p11, %p2262_p6 }
  0x5d   : > { %2270 = shalt.err (!%p2267_p12)
}
  0x5e   : > { %s2271_s28 = scalar_lea.vmem %s278_s16, 512  ;;  %p2279_p8 = scmp.lt.s32.totalorder %s278_s16, %s278_s16 }
  0x5f   : > { %p2272_p13 = scmp.ne.s32.totalorder %s278_s16, %s2271_s28  ;;  %p2280_p9 = scmp.lt.s32.totalorder %s2271_s28, %s2271_s28 }
  0x61   : > { %p2274_p0 = pnand %p2272_p13, %p2567_p3  ;;  %p2281_p10 = por %p2280_p9, %p2279_p8 }
  0x63   : > { %p2275_p7 = pneg %p2274_p0 }
  0x65   : > { %p2282_p1 = pnand %p2281_p10, %p2275_p7 }
  0x67   : > { %2285 = shalt.err (!%p2282_p1)
}
  0x68   : > { %s3026_s1 = smov 8   ;;  %s3027_s14 = smov 128  }
  0x69   : > { %2075 = dma.hbm_to_vmem [thread:$0]  (!%p2553_p2), %s2988_s2, 512, %s278_s16, [#allocation6], %s3027_s14, %s3027_s14, %s3026_s1  }
  0x6a   : > { %s2286_s9 = scalar_lea.hbm %s2993_s7, 2048 }
  0x6b   : > { %p2287_p4 = scmp.ne.s32.totalorder %s2993_s7, %s2286_s9  ;;  %p2293_p11 = scmp.lt.u32.totalorder %s2286_s9, %s2993_s7 }
  0x6d   : > { %p2289_p5 = pnand %p2287_p4, %p2567_p3 }
  0x6f   : > { %p2290_p6 = pneg %p2289_p5 }
  0x71   : > { %p2295_p12 = pnand %p2293_p11, %p2290_p6 }
  0x73   : > { %2298 = shalt.err (!%p2295_p12)
}
  0x74   : > { %s2299_s29 = scalar_lea.vmem %s313_s27, 2048  ;;  %p2307_p8 = scmp.lt.s32.totalorder %s313_s27, %s313_s27 }
  0x75   : > { %p2300_p13 = scmp.ne.s32.totalorder %s313_s27, %s2299_s29  ;;  %p2308_p9 = scmp.lt.s32.totalorder %s2299_s29, %s2299_s29 }
  0x77   : > { %p2302_p0 = pnand %p2300_p13, %p2567_p3  ;;  %p2309_p10 = por %p2308_p9, %p2307_p8 }
  0x79   : > { %p2303_p7 = pneg %p2302_p0 }
  0x7b   : > { %p2310_p1 = pnand %p2309_p10, %p2303_p7 }
  0x7d   : > { %2313 = shalt.err (!%p2310_p1)
}
  0x7e   : > { %2081 = dma.hbm_to_vmem [thread:$0]  (!%p2553_p2), %s2993_s7, 2048, %s313_s27, [#allocation9], %s3027_s14, %s3027_s14, %s3026_s1  }
  0x7f   : > { %p1731_p4 = scmp.ge.s32.totalorder %s2416_s12, 2 }
  0x80   : > { %p3028_p3 = scmp.ne.s32.totalorder (!%p1731_p4), %s3016_s19, 0 }
  0x81   : > { %325 = sbr.rel (%p1731_p4) target bundleno = 171 (0xab), region = 48 }
  0x88   : > { %328 = sbr.rel (!%p3028_p3) target bundleno = 171 (0xab), region = 52  ;;  %s329_s24 = sand.u32 (%p3028_p3), 1, %s2412_s11  }
  0x89   : > { %s334_s28 = smul.u32 (%p3028_p3), 3, %s2416_s12  ;;  %s2661_s1 = scalar_lea.sflag (%p3028_p3), [#allocation3], %s329_s24 }
  0x8a   : > { %s2048_s26 = smul.u32 (%p3028_p3), 96, %s329_s24 }
  0x8b   : > { %s335_s6 = ssub.s32 (%p3028_p3), 5, %s334_s28 }
  0x8c   : > { %p336_p5 = scmp.lt.s32.totalorder (%p3028_p3), %s335_s6, 3  ;;  %s333_s14 = scalar_lea.vmem (%p3028_p3), [#allocation2], %s2048_s26 }
  0x8f   : > { %s3049_s6 = smov (!%p336_p5, %s335_s6), 3 }
  0x90   : > { %s2658_s8 = sshll.u32 %s3049_s6, 9 }
  0x91   : > { %s342_s27 = ssub.s32 1536, %s2658_s8 }
  0x92   : > { %343 = vsyncadd %s2661_s1, %s342_s27  ;;  %p1735_p2 = scmp.ne.s32.totalorder %s2658_s8, 0  ;;  %s1779_s19 = smul.u32 1536, %s2416_s12 }
  0x93   : > { %s350_s18 = sshll.u32 %s333_s14, 4  ;;  %s2318_s29 = scalar_lea.hbm %s2986_s0, 2560  ;;  %s2671_s18 = int_to_ptr.vmem [resolvable:$true] %s350_s18 }
  0x94   : > { %s2669_s21 = scalar_lea.hbm %s2986_s0, %s1779_s19 }
  0x95   : > { %s2314_s22 = scalar_lea.hbm %s2669_s21, %s2658_s8  ;;  %p2319_p13 = scmp.lt.u32.totalorder %s2669_s21, %s2986_s0 }
  0x96   : > { %p2315_p6 = scmp.ne.s32.totalorder %s2669_s21, %s2314_s22  ;;  %p2320_p0 = scmp.lt.u32.totalorder %s2318_s29, %s2314_s22 }
  0x97   : > { %p2322_p8 = scmp.lt.u32.totalorder %s2314_s22, %s2669_s21 }
  0x98   : > { %p2316_p11 = pnand %p2315_p6, %p1735_p2  ;;  %p2321_p7 = por %p2320_p0, %p2319_p13 }
  0x9a   : > { %p2317_p12 = pneg %p2316_p11  ;;  %p2323_p9 = por %p2322_p8, %p2321_p7 }
  0x9c   : > { %p2324_p10 = pnand %p2323_p9, %p2317_p12 }
  0x9e   : > { %2327 = shalt.err (!%p2324_p10)
}
  0x9f   : > { %s2328_s24 = scalar_lea.vmem %s2671_s18, %s2658_s8  ;;  %s2426_s28 = smov [#allocation2]  }
  0xa0   : > { %p2329_p1 = scmp.ne.s32.totalorder %s2671_s18, %s2328_s24  ;;  %s2332_s26 = sshll.u32 %s2426_s28, 4  ;;  %s2333_s26 = int_to_ptr.vmem [resolvable:$false] %s2332_s26 }
  0xa1   : > { %s2334_s6 = scalar_lea.vmem %s2333_s26, 3072  ;;  %p2335_p6 = scmp.lt.s32.totalorder %s2671_s18, %s2333_s26 }
  0xa2   : > { %p2330_p3 = pnand %p2329_p1, %p1735_p2  ;;  %p2336_p11 = scmp.lt.s32.totalorder %s2334_s6, %s2328_s24 }
  0xa4   : > { %p2331_p5 = pneg %p2330_p3  ;;  %p2337_p13 = por %p2336_p11, %p2335_p6 }
  0xa6   : > { %p2338_p0 = pnand %p2337_p13, %p2331_p5 }
  0xa8   : > { %2341 = shalt.err (!%p2338_p0)
}
  0xa9   : > { %s2427_s27 = smov 256   ;;  %s2428_s14 = smov 16  }
  0xaa   : > { %356 = dma.hbm_to_vmem [thread:$0]  (%p1735_p2), %s2669_s21, %s2658_s8, %s2671_s18, %s2661_s1, %s2427_s27, %s2427_s27, %s2428_s14  }
  0xab PF: > { %p3029_p12 = scmp.ne.s32.totalorder %s3022_s23, 0 }
  0xac   : > { %s2701_s19 = sand.u32 (!%p3029_p12), 1, %s2408_s10   ;;  %p3030_p7 = scmp.ne.s32.totalorder (!%p3029_p12), %s3017_s20, 0 }
  0xad   : > { %362 = sbr.rel (%p3029_p12) target bundleno = 1591 (0x637), region = 56  ;;  %s365_s9 = scalar_lea.sflag (!%p3029_p12), [#allocation3], %s2701_s19 }
  0xae   : > { %s2049_s30 = smul.u32 (!%p3029_p12), 96, %s2701_s19 }
  0xb0   : > { %s368_s22 = scalar_lea.vmem (!%p3029_p12), [#allocation2], %s2049_s30 }
  0xb4   : > { %2387 = dma.done.wait (%p3030_p7), %s365_s9, 1536  }
  0xb5   : > { %2389 = vsyncadd (%p3030_p7), %s365_s9, 4294965760  ;;  %p3031_p2 = scmp.eq.s32.totalorder %s2506_s13, 0 }
  0xb7   : > { %2391 = dma.done.wait (%p3031_p2), [#allocation6], 1024   ;;  %p3032_p8 = pmov %p3031_p2 }
  0xb8   : > { %p3033_p9 = pmov %p3031_p2 }
  0xb9   : > { %2393 = vsyncadd (%p3032_p8), [#allocation6], 4294966272 }
  0xba   : > { %2395 = dma.done.wait (%p3033_p9), [#allocation9], 8192   ;;  %p3034_p10 = pmov %p3031_p2 }
  0xbb   : > { %vm443_vm0 = vcmask 523264   ;;  %v2717_v0 = vld [vmem:[%s368_s22] sm:$0xff]  ;;  %v2719_v1 = vld [vmem:[%s368_s22 + $0x8] sm:$0xff]  ;;  %v2727_v5 = vld [vmem:[%s368_s22 + $0x10] sm:$0xff]  ;;  %s3035_s15 = sld [smem:[#allocation22_spill]]  ;;  %vm1039_vm1 = vcmask 130048  }
  0xbc   : > { %2397 = vsyncadd (%p3034_p10), [#allocation9], 4294959104  ;;  %v2721_v2 = vld [vmem:[%s368_s22 + $0x20] sm:$0xff]  ;;  %v444_v3 = vsel %vm443_vm0, %v2719_v1, 0.0  ;;  %v2725_v4 = vld [vmem:[%s368_s22 + $0x28] sm:$0xff]  ;;  %vm2430_vm2 = vmmov 0  }
  0xbd   : > { %v2729_v6 = vld [vmem:[%s368_s22 + $0x18] sm:$0xff]  ;;  %v445_v7 = vadd.f32 %v444_v3, %v2717_v0  ;;  %v452_v8 = vsel %vm443_vm0, %v2725_v4, 0.0  ;;  %v2736_v10 = vld [vmem:[%s368_s22 + $0x30] sm:$0xff]  ;;  %v2743_v14 = vld [vmem:[%s368_s22 + $0x48] sm:$0xff]  ;;  %s2050_s17 = smul.u32 24, %s2701_s19  ;;  %s3036_s25 = sld [smem:[#allocation23_spill]] }
  0xbe   : > { %v448_v9 = vsel %vm443_vm0, %v2729_v6, 0.0  ;;  %v2738_v11 = vld [vmem:[%s368_s22 + $0x38] sm:$0xff]  ;;  %v453_v12 = vadd.f32 %v452_v8, %v2721_v2  ;;  %v2749_v18 = vld [vmem:[%s368_s22 + $0x40] sm:$0xff]  ;;  %v460_v19 = vsel %vm443_vm0, %v2743_v14, 0.0  ;;  %v2753_v20 = vld [vmem:[%s368_s22 + $0x50] sm:$0xff]  ;;  %s1595_s28 = scalar_lea.sflag [#allocation4], %s2701_s19 }
  0xbf   : > { %v456_v13 = vsel %vm443_vm0, %v2738_v11, 0.0  ;;  %v2745_v15 = vld [vmem:[%s368_s22 + $0x58] sm:$0xff]  ;;  %446 = vadd.xlane.f32.xlu0 %v445_v7  ;;  %v449_v16 = vadd.f32 %v448_v9, %v2727_v5  ;;  %v461_v22 = vadd.f32 %v460_v19, %v2749_v18  ;;  %v602_v24 = vld [vmem:[#allocation8 + $0x8] sm:$0xff]  ;;  %v601_v26 = vld [vmem:[#allocation8] sm:$0xff]  ;;  %s418_s24 = scalar_lea.vmem [#allocation11], %s2050_s17  ;;  %s3037_s26 = sld [smem:[#allocation19_spill]] }
  0xc0   : > { %454 = vadd.xlane.f32.xlu1 %v453_v12  ;;  %v457_v17 = vadd.f32 %v456_v13, %v2736_v10  ;;  %v464_v21 = vsel %vm443_vm0, %v2745_v15, 0.0  ;;  %v604_v25 = vld [vmem:[#allocation8 + $0x18] sm:$0xff]  ;;  %v603_v28 = vld [vmem:[#allocation8 + $0x10] sm:$0xff]  ;;  %v606_v29 = vld [vmem:[#allocation8 + $0x28] sm:$0xff] }
  0xc1   : > { %v465_v23 = vadd.f32 %v464_v21, %v2753_v20  ;;  %v1936_v27 = vpack.c.bf16 %v604_v25, %v602_v24  ;;  %v608_v30 = vld [vmem:[#allocation8 + $0x38] sm:$0xff]  ;;  %v1938_v31 = vpack.c.bf16 %v603_v28, %v601_v26  ;;  %v605_v33 = vld [vmem:[#allocation8 + $0x20] sm:$0xff]  ;;  %v607_v34 = vld [vmem:[#allocation8 + $0x30] sm:$0xff] }
  0xc2   : > { %v1940_v32 = vpack.c.bf16 %v608_v30, %v606_v29  ;;  %v610_v35 = vld [vmem:[#allocation8 + $0x48] sm:$0xff]  ;;  %v612_v36 = vld [vmem:[#allocation8 + $0x58] sm:$0xff]  ;;  %v1942_v37 = vpack.c.bf16 %v607_v34, %v605_v33  ;;  %v609_v39 = vld [vmem:[#allocation8 + $0x40] sm:$0xff] }
  0xc3   : > { %450 = vadd.xlane.f32.xlu0 %v449_v16  ;;  %1937 = vmatprep.subr.bf16.mxu0 %v1936_v27  ;;  %v1944_v38 = vpack.c.bf16 %v612_v36, %v610_v35  ;;  %v611_v40 = vld [vmem:[#allocation8 + $0x50] sm:$0xff]  ;;  %v614_v41 = vld [vmem:[#allocation8 + $0x68] sm:$0xff]  ;;  %v616_v42 = vld [vmem:[#allocation8 + $0x78] sm:$0xff] }
  0xc4   : > { %458 = vadd.xlane.f32.xlu1 %v457_v17  ;;  %1939 = vmatpush1.bf16.msra.mxu0 %v1938_v31  ;;  %v1946_v43 = vpack.c.bf16 %v611_v40, %v609_v39  ;;  %v1948_v44 = vpack.c.bf16 %v616_v42, %v614_v41  ;;  %v613_v45 = vld [vmem:[#allocation8 + $0x60] sm:$0xff]  ;;  %v615_v46 = vld [vmem:[#allocation8 + $0x70] sm:$0xff]  ;;  %v618_v47 = vld [vmem:[#allocation8 + $0x88] sm:$0xff] }
  0xc5   : > { %1941 = vmatprep.subr.bf16.mxu0 %v1940_v32  ;;  %v620_v48 = vld [vmem:[#allocation8 + $0x98] sm:$0xff]  ;;  %v1950_v49 = vpack.c.bf16 %v615_v46, %v613_v45  ;;  %v617_v51 = vld [vmem:[#allocation8 + $0x80] sm:$0xff]  ;;  %v619_v52 = vld [vmem:[#allocation8 + $0x90] sm:$0xff]  ;;  %p3038_p1 = scmp.ne.s32.totalorder %s3037_s26, 0 }
  0xc6   : > { %v1952_v50 = vpack.c.bf16 %v620_v48, %v618_v47  ;;  %v622_v53 = vld [vmem:[#allocation8 + $0xa8] sm:$0xff]  ;;  %v624_v54 = vld [vmem:[#allocation8 + $0xb8] sm:$0xff]  ;;  %v1954_v55 = vpack.c.bf16 %v619_v52, %v617_v51  ;;  %v621_v57 = vld [vmem:[#allocation8 + $0xa0] sm:$0xff]  ;;  %s1602_s6 = smul.u32 (%p3038_p1), 3, %s2506_s13 }
  0xc7   : > { %462 = vadd.xlane.f32.xlu0 %v461_v22  ;;  %v1956_v56 = vpack.c.bf16 %v624_v54, %v622_v53  ;;  %v623_v58 = vld [vmem:[#allocation8 + $0xb0] sm:$0xff]  ;;  %v626_v59 = vld [vmem:[#allocation8 + $0xc8] sm:$0xff]  ;;  %v628_v60 = vld [vmem:[#allocation8 + $0xd8] sm:$0xff] }
  0xc8   : > { %466 = vadd.xlane.f32.xlu1 %v465_v23  ;;  %1943 = vmatpush1.bf16.msra.mxu0 %v1942_v37  ;;  %v1958_v61 = vpack.c.bf16 %v623_v58, %v621_v57  ;;  %v1960_v62 = vpack.c.bf16 %v628_v60, %v626_v59  ;;  %v625_v63 = vld [vmem:[#allocation8 + $0xc0] sm:$0xff]  ;;  %v627_v3 = vld [vmem:[#allocation8 + $0xd0] sm:$0xff]  ;;  %v632_v51 = vld [vmem:[#allocation8 + $0xf8] sm:$0xff]  ;;  %s1603_s27 = ssub.s32 (%p3038_p1), 5, %s1602_s6 }
  0xc9   : > { %1945 = vmatprep.subr.bf16.mxu0 %v1944_v38  ;;  %v1962_v7 = vpack.c.bf16 %v627_v3, %v625_v63  ;;  %v629_v53 = vld [vmem:[#allocation8 + $0xe0] sm:$0xff]  ;;  %v631_v54 = vld [vmem:[#allocation8 + $0xf0] sm:$0xff]  ;;  %v636_v57 = vld [vmem:[#allocation8 + $0x118] sm:$0xff]  ;;  %p1604_p3 = scmp.lt.s32.totalorder (%p3038_p1), %s1603_s27, 3 }
  0xca   : > { %v633_v59 = vld [vmem:[#allocation8 + $0x100] sm:$0xff]  ;;  %v635_v60 = vld [vmem:[#allocation8 + $0x110] sm:$0xff]  ;;  %v640_v63 = vld [vmem:[#allocation8 + $0x138] sm:$0xff] }
  0xcc   : > { %1947 = vmatpush1.bf16.msra.mxu0 %v1946_v43 }
  0xcd   : > { %1949 = vmatprep.subr.bf16.mxu0 %v1948_v44 }
  0xd0   : > { %1951 = vmatpush1.bf16.msra.mxu0 %v1950_v49 }
  0xd1   : > { %1953 = vmatprep.subr.bf16.mxu0 %v1952_v50  ;;  %v630_v50 = vld [vmem:[#allocation8 + $0xe8] sm:$0xff] }
  0xd2   : > { %v1964_v52 = vpack.c.bf16 %v632_v51, %v630_v50  ;;  %v577_v50 = vld [vmem:[%s2990_s4] sm:$0x3] }
  0xd4   : > { %1955 = vmatpush1.bf16.msra.mxu0 %v1954_v55  ;;  %v1966_v55 = vpack.c.bf16 %v631_v54, %v629_v53 }
  0xd5   : > { %1957 = vmatprep.subr.bf16.mxu0 %v1956_v56  ;;  %v634_v56 = vld [vmem:[#allocation8 + $0x108] sm:$0xff] }
  0xd6   : > { %v1968_v58 = vpack.c.bf16 %v636_v57, %v634_v56 }
  0xd8   : > { %1959 = vmatpush1.bf16.msra.mxu0 %v1958_v61  ;;  %v1970_v61 = vpack.c.bf16 %v635_v60, %v633_v59 }
  0xd9   : > { %1961 = vmatprep.subr.bf16.mxu0 %v1960_v62  ;;  %v638_v62 = vld [vmem:[#allocation8 + $0x128] sm:$0xff] }
  0xda   : > { %v1972_v3 = vpack.c.bf16 %v640_v63, %v638_v62 }
  0xdc   : > { %1963 = vmatpush1.bf16.msra.mxu0 %v1962_v7  ;;  %v637_v7 = vld [vmem:[#allocation8 + $0x120] sm:$0xff] }
  0xdd   : > { %1965 = vmatprep.subr.bf16.mxu0 %v1964_v52 }
  0xe0   : > { %1967 = vmatpush1.bf16.msra.mxu0 %v1966_v55 }
  0xe1   : > { %1969 = vmatprep.subr.bf16.mxu0 %v1968_v58 }
  0xe4   : > { %1971 = vmatpush1.bf16.msra.mxu0 %v1970_v61 }
  0xe5   : > { %1973 = vmatprep.subr.bf16.mxu0 %v1972_v3 }
 0x14c   : > { %v447_v8 = vpop.xlane.xlu0 %446 }
 0x14d   : > { %v469_v9 = vmul.f32 0.0052083335, %v447_v8  ;;  %v455_v12 = vpop.xlane.xlu1 %454  ;;  %v639_v8 = vld [vmem:[#allocation8 + $0x130] sm:$0xff] }
 0x14e   : > { %v471_v13 = vmul.f32 0.0052083335, %v455_v12  ;;  %v642_v12 = vld [vmem:[#allocation8 + $0x148] sm:$0xff] }
 0x14f   : > { %v2760_v16 = vsub.f32 %v2717_v0, %v469_v9  ;;  %v2763_v17 = vsub.f32 %v2719_v1, %v469_v9  ;;  %v1974_v9 = vpack.c.bf16 %v639_v8, %v637_v7 }
 0x150   : > { %v2766_v19 = vsub.f32 %v2721_v2, %v471_v13  ;;  %v2769_v21 = vsub.f32 %v2725_v4, %v471_v13  ;;  %v451_v22 = vpop.xlane.xlu0 %450  ;;  %v644_v13 = vld [vmem:[#allocation8 + $0x158] sm:$0xff] }
 0x151   : > { %v470_v23 = vmul.f32 0.0052083335, %v451_v22  ;;  %v459_v24 = vpop.xlane.xlu1 %458  ;;  %v487_v25 = vmul.f32 %v2760_v16, %v2760_v16  ;;  %v488_v26 = vmul.f32 %v2763_v17, %v2763_v17  ;;  %1975 = vmatpush1.bf16.msra.mxu0 %v1974_v9  ;;  %v1976_v22 = vpack.c.bf16 %v644_v13, %v642_v12 }
 0x152   : > { %v472_v0 = vmul.f32 0.0052083335, %v459_v24  ;;  %v491_v1 = vmul.f32 %v2766_v19, %v2766_v19  ;;  %v492_v2 = vmul.f32 %v2769_v21, %v2769_v21  ;;  %v643_v24 = vld [vmem:[#allocation8 + $0x150] sm:$0xff] }
 0x153   : > { %v2780_v27 = vsub.f32 %v2727_v5, %v470_v23  ;;  %v2783_v4 = vsub.f32 %v2729_v6, %v470_v23  ;;  %v499_v28 = vsel %vm443_vm0, %v488_v26, 0.0  ;;  %v641_v23 = vld [vmem:[#allocation8 + $0x140] sm:$0xff]  ;;  %1977 = vmatprep.subr.bf16.mxu0 %v1976_v22  ;;  %v646_v26 = vld [vmem:[#allocation8 + $0x168] sm:$0xff] }
 0x154   : > { %v2787_v29 = vsub.f32 %v2736_v10, %v472_v0  ;;  %v2790_v30 = vsub.f32 %v2738_v11, %v472_v0  ;;  %v463_v31 = vpop.xlane.xlu0 %462  ;;  %v500_v32 = vadd.f32 %v499_v28, %v487_v25  ;;  %v507_v33 = vsel %vm443_vm0, %v492_v2, 0.0  ;;  %v648_v0 = vld [vmem:[#allocation8 + $0x178] sm:$0xff]  ;;  %v647_v28 = vld [vmem:[#allocation8 + $0x170] sm:$0xff] }
 0x155   : > { %v473_v34 = vmul.f32 0.0052083335, %v463_v31  ;;  %v467_v35 = vpop.xlane.xlu1 %466  ;;  %v489_v5 = vmul.f32 %v2780_v27, %v2780_v27  ;;  %v490_v6 = vmul.f32 %v2783_v4, %v2783_v4  ;;  %v508_v37 = vadd.f32 %v507_v33, %v491_v1  ;;  %v645_v1 = vld [vmem:[#allocation8 + $0x160] sm:$0xff] }
 0x156   : > { %501 = vadd.xlane.f32.xlu0 %v500_v32  ;;  %v474_v36 = vmul.f32 0.0052083335, %v467_v35  ;;  %v493_v10 = vmul.f32 %v2787_v29, %v2787_v29  ;;  %v494_v11 = vmul.f32 %v2790_v30, %v2790_v30  ;;  %v1978_v25 = vpack.c.bf16 %v643_v24, %v641_v23 }
 0x157   : > { %v2802_v38 = vsub.f32 %v2749_v18, %v473_v34  ;;  %v2805_v39 = vsub.f32 %v2743_v14, %v473_v34  ;;  %v503_v40 = vsel %vm443_vm0, %v490_v6, 0.0  ;;  %v1980_v2 = vpack.c.bf16 %v648_v0, %v646_v26 }
 0x158   : > { %v2809_v41 = vsub.f32 %v2753_v20, %v474_v36  ;;  %v2812_v42 = vsub.f32 %v2745_v15, %v474_v36  ;;  %v504_v43 = vadd.f32 %v503_v40, %v489_v5  ;;  %v511_v44 = vsel %vm443_vm0, %v494_v11, 0.0  ;;  %1979 = vmatpush1.bf16.msra.mxu0 %v1978_v25 }
 0x159   : > { %v495_v45 = vmul.f32 %v2802_v38, %v2802_v38  ;;  %v496_v18 = vmul.f32 %v2805_v39, %v2805_v39  ;;  %v512_v14 = vadd.f32 %v511_v44, %v493_v10  ;;  %v1982_v31 = vpack.c.bf16 %v647_v28, %v645_v1  ;;  %1981 = vmatprep.subr.bf16.mxu0 %v1980_v2 }
 0x15a   : > { %509 = vadd.xlane.f32.xlu0 %v508_v37  ;;  %505 = vadd.xlane.f32.xlu1 %v504_v43  ;;  %v497_v46 = vmul.f32 %v2809_v41, %v2809_v41  ;;  %v498_v20 = vmul.f32 %v2812_v42, %v2812_v42  ;;  %v555_v34 = vlaneseq }
 0x15b   : > { %v515_v15 = vsel %vm443_vm0, %v496_v18, 0.0 }
 0x15c   : > { %v516_v47 = vadd.f32 %v515_v15, %v495_v45  ;;  %v519_v48 = vsel %vm443_vm0, %v498_v20, 0.0  ;;  %1983 = vmatpush1.bf16.msra.mxu0 %v1982_v31  ;;  %v556_v10 = vshrl.u32 %v555_v34, 7 }
 0x15d   : > { %v520_v49 = vadd.f32 %v519_v48, %v497_v46 }
 0x15e   : > { %513 = vadd.xlane.f32.xlu1 %v512_v14  ;;  %517 = vadd.xlane.f32.xlu0 %v516_v47  ;;  %v2825_v14 = vsub.s32 0, %v556_v10  ;;  %v2827_v46 = vsub.s32 1, %v556_v10  ;;  %v553_v47 = vld [vmem:[%s2989_s3] sm:$0x3] }
 0x15f   : > { %v649_v10 = vld [vmem:[%s3035_s15] sm:$0x3] }
 0x160   : > { %v558_v51 = vrot.slane %v553_v47, %v2825_v14  ;;  %v562_v52 = vrot.slane %v553_v47, %v2827_v46  ;;  %v582_v56 = vrot.slane %v577_v50, %v2825_v14  ;;  %v586_v57 = vrot.slane %v577_v50, %v2827_v46 }
 0x162   : > { %521 = vadd.xlane.f32.xlu1 %v520_v49 }
 0x1e3   : > { %v502_v32 = vpop.xlane.xlu0 %501 }
 0x1e4   : > { %v523_v33 = vmul.f32 0.0052083335, %v502_v32 }
 0x1e6   : > { %v529_v35 = vadd.f32 1e-05, %v523_v33 }
 0x1e7   : > { %v506_v5 = vpop.xlane.xlu1 %505  ;;  %v510_v6 = vpop.xlane.xlu0 %509 }
 0x1e8   : > { %2142 = vrsqrt.f32 %v529_v35  ;;  %v524_v36 = vmul.f32 0.0052083335, %v506_v5  ;;  %v525_v37 = vmul.f32 0.0052083335, %v510_v6 }
 0x1ea   : > { %v530_v11 = vadd.f32 1e-05, %v524_v36  ;;  %v531_v40 = vadd.f32 1e-05, %v525_v37 }
 0x1eb   : > { %v514_v43 = vpop.xlane.xlu1 %513  ;;  %v518_v44 = vpop.xlane.xlu0 %517 }
 0x1ec   : > { %2144 = vrsqrt.f32 %v530_v11  ;;  %v526_v45 = vmul.f32 0.0052083335, %v514_v43  ;;  %v527_v18 = vmul.f32 0.0052083335, %v518_v44  ;;  %v658_v44 = vrot.slane %v649_v10, %v2827_v46  ;;  %v782_v46 = vld [vmem:[#allocation5 + $0x10] sm:$0xff] }
 0x1ed   : > { %2146 = vrsqrt.f32 %v531_v40 }
 0x1ee   : > { %v532_v20 = vadd.f32 1e-05, %v526_v45  ;;  %v533_v15 = vadd.f32 1e-05, %v527_v18 }
 0x1ef   : > { %v522_v48 = vpop.xlane.xlu1 %521 }
 0x1f0   : > { %2148 = vrsqrt.f32 %v532_v20  ;;  %v528_v49 = vmul.f32 0.0052083335, %v522_v48 }
 0x1f1   : > { %2150 = vrsqrt.f32 %v533_v15 }
 0x1f2   : > { %v2143_v53 = vpop.eup %2142  ;;  %v534_v54 = vadd.f32 1e-05, %v528_v49 }
 0x1f3   : > { %v542_v55 = vmul.f32 %v2143_v53, %v2763_v17  ;;  %v541_v58 = vmul.f32 %v2143_v53, %v2760_v16 }
 0x1f4   : > { %2152 = vrsqrt.f32 %v534_v54 }
 0x1f5   : > { %v566_v59 = vmul.f32 %v562_v52, %v542_v55  ;;  %v565_v60 = vmul.f32 %v558_v51, %v541_v58 }
 0x1f6   : > { %v2145_v61 = vpop.eup %2144 }
 0x1f7   : > { %v2147_v62 = vpop.eup %2146  ;;  %v590_v63 = vadd.f32 %v586_v57, %v566_v59  ;;  %v589_v3 = vadd.f32 %v582_v56, %v565_v60  ;;  %v544_v7 = vmul.f32 %v2145_v61, %v2783_v4  ;;  %v543_v8 = vmul.f32 %v2145_v61, %v2780_v27 }
 0x1f8   : > { %v546_v9 = vmul.f32 %v2147_v62, %v2769_v21  ;;  %v545_v17 = vmul.f32 %v2147_v62, %v2766_v19 }
 0x1f9   : > { %1746 = vmatprep.mubr.msk.f32.mxu0 %vm443_vm0, %v590_v63  ;;  %v568_v12 = vmul.f32 %v562_v52, %v544_v7  ;;  %v567_v13 = vmul.f32 %v558_v51, %v543_v8 }
 0x1fa   : > { %v2149_v16 = vpop.eup %2148  ;;  %744 = vmatmul.mubr.f32.vlgmr.msra.gmra.mrb[0].mxu0 %v589_v3  ;;  %v570_v22 = vmul.f32 %v562_v52, %v546_v9  ;;  %v569_v0 = vmul.f32 %v558_v51, %v545_v17  ;;  %v783_v3 = vld [vmem:[#allocation5 + $0x18] sm:$0xff] }
 0x1fb   : > { %v2151_v23 = vpop.eup %2150  ;;  %v592_v24 = vadd.f32 %v586_v57, %v568_v12  ;;  %v591_v25 = vadd.f32 %v582_v56, %v567_v13  ;;  %v548_v26 = vmul.f32 %v2149_v16, %v2790_v30  ;;  %v547_v4 = vmul.f32 %v2149_v16, %v2787_v29 }
 0x1fc   : > { %v594_v21 = vadd.f32 %v586_v57, %v570_v22  ;;  %v550_v19 = vmul.f32 %v2151_v23, %v2805_v39  ;;  %v593_v2 = vadd.f32 %v582_v56, %v569_v0  ;;  %v549_v31 = vmul.f32 %v2151_v23, %v2802_v38 }
 0x1fd   : > { %1747 = vmatprep.mubr.msk.f32.mxu0 %vm443_vm0, %v592_v24  ;;  %v572_v27 = vmul.f32 %v562_v52, %v548_v26  ;;  %v571_v28 = vmul.f32 %v558_v51, %v547_v4 }
 0x1fe   : > { %v2153_v1 = vpop.eup %2152  ;;  %750 = vmatmul.mubr.f32.gmra.mrb[2].mxu0 %v591_v25  ;;  %v574_v33 = vmul.f32 %v562_v52, %v550_v19  ;;  %v573_v34 = vmul.f32 %v558_v51, %v549_v31 }
 0x1ff   : > { %1748 = vmatprep.mubr.msk.f32.mxu0 %vm443_vm0, %v594_v21  ;;  %v596_v32 = vadd.f32 %v586_v57, %v572_v27  ;;  %v552_v30 = vmul.f32 %v2153_v1, %v2812_v42  ;;  %v595_v29 = vadd.f32 %v582_v56, %v571_v28  ;;  %v551_v35 = vmul.f32 %v2153_v1, %v2809_v41  ;;  %v780_v42 = vld [vmem:[#allocation5] sm:$0xff] }
 0x200   : > { %v598_v39 = vadd.f32 %v586_v57, %v574_v33  ;;  %v597_v6 = vadd.f32 %v582_v56, %v573_v34  ;;  %1839 = vmatprep.mubr.f32.mxu1 %v780_v42  ;;  %v654_v41 = vrot.slane %v649_v10, %v2825_v14 }
 0x201   : > { %v576_v5 = vmul.f32 %v562_v52, %v552_v30  ;;  %v575_v36 = vmul.f32 %v558_v51, %v551_v35 }
 0x202   : > { %756 = vmatmul.mubr.f32.gmra.mrb[4].mxu0 %v593_v2 }
 0x203   : > { %1749 = vmatprep.mubr.msk.f32.mxu0 %vm443_vm0, %v596_v32  ;;  %v600_v37 = vadd.f32 %v586_v57, %v576_v5  ;;  %v599_v38 = vadd.f32 %v582_v56, %v575_v36  ;;  %v781_v57 = vld [vmem:[#allocation5 + $0x8] sm:$0xff] }
 0x206   : > { %762 = vmatmul.mubr.f32.gmra.mrb[6].mxu0 %v595_v29 }
 0x207   : > { %1750 = vmatprep.mubr.msk.f32.mxu0 %vm443_vm0, %v598_v39 }
 0x20a   : > { %768 = vmatmul.mubr.f32.gmra.mrb[8].mxu0 %v597_v6 }
 0x20b   : > { %1751 = vmatprep.mubr.msk.f32.mxu0 %vm443_vm0, %v600_v37 }
 0x20e   : > { %774 = vmatmul.mubr.f32.gmra.mrb[10].mxu0 %v599_v38 }
 0x2cd   : > { %v745_v11 = vpop.f32.mrb[0].mxu0 }
 0x2ce   : > { %v746_v40 = vadd.f32 %v745_v11, %v654_v41  ;;  %v747_v43 = vpop.f32.mrb[1].mxu0 }
 0x2cf   : > { %v748_v15 = vadd.f32 %v747_v43, %v658_v44 }
 0x2d1   : > { %v751_v45 = vpop.f32.mrb[2].mxu0 }
 0x2d2   : > { %v752_v18 = vadd.f32 %v751_v45, %v654_v41  ;;  %v753_v20 = vpop.f32.mrb[3].mxu0 }
 0x2d3   : > { %v754_v47 = vadd.f32 %v753_v20, %v658_v44 }
 0x2d4   : > { %v1984_v48 = vpack.c.bf16 %v752_v18, %v746_v40 }
 0x2d5   : > { %v1996_v49 = vpack.c.bf16 %v754_v47, %v748_v15  ;;  %v757_v50 = vpop.f32.mrb[4].mxu0 }
 0x2d6   : > { %v758_v51 = vadd.f32 %v757_v50, %v654_v41  ;;  %v759_v52 = vpop.f32.mrb[5].mxu0  ;;  %1985 = vmatprep.subr.bf16.mxu1 %v1984_v48 }
 0x2d7   : > { %1987 = vmatpush3.bf16.xpose.msra.mxu1 %v1984_v48  ;;  %v760_v55 = vadd.f32 %v759_v52, %v658_v44 }
 0x2d9   : > { %v763_v53 = vpop.f32.mrb[6].mxu0 }
 0x2da   : > { %v764_v54 = vadd.f32 %v763_v53, %v654_v41  ;;  %v765_v14 = vpop.f32.mrb[7].mxu0 }
 0x2db   : > { %v766_v56 = vadd.f32 %v765_v14, %v658_v44 }
 0x2dc   : > { %v1988_v58 = vpack.c.bf16 %v764_v54, %v758_v51 }
 0x2dd   : > { %v2862_v59 = vpack.c.bf16 %v766_v56, %v760_v55  ;;  %v769_v60 = vpop.f32.mrb[8].mxu0 }
 0x2de   : > { %v770_v61 = vadd.f32 %v769_v60, %v654_v41  ;;  %v771_v62 = vpop.f32.mrb[9].mxu0  ;;  %1840 = vmatmul.mubr.f32.vlgmr.msra.gmra.mrb[0].mxu1 %v781_v57  ;;  %1989 = vmatprep.subr.bf16.mxu1 %v1988_v58 }
 0x2df   : > { %v772_v63 = vadd.f32 %v771_v62, %v658_v44  ;;  %1991 = vmatpush3.bf16.xpose.msra.mxu1 %v1988_v58  ;;  %1842 = vmatprep.mubr.f32.mxu1 %v782_v46 }
 0x2e1   : > { %v775_v7 = vpop.f32.mrb[10].mxu0 }
 0x2e2   : > { %v776_v8 = vadd.f32 %v775_v7, %v654_v41  ;;  %v777_v9 = vpop.f32.mrb[11].mxu0  ;;  %1843 = vmatmul.mubr.f32.gmra.mrb[2].mxu1 %v783_v3 }
 0x2e3   : > { %v778_v17 = vadd.f32 %v777_v9, %v658_v44  ;;  %1849 = vmatprep.mubr.f32.mxu1 %v780_v42 }
 0x2e4   : > { %v1992_v12 = vpack.c.bf16 %v776_v8, %v770_v61 }
 0x2e5   : > { %v2864_v13 = vpack.c.bf16 %v778_v17, %v772_v63 }
 0x2e6   : > { %1850 = vmatmul.mubr.f32.vlgmr.msra.gmra.mrb[4].mxu1 %v781_v57  ;;  %1993 = vmatprep.subr.bf16.mxu1 %v1992_v12 }
 0x2e7   : > { %1995 = vmatpush3.bf16.xpose.msra.mxu1 %v1992_v12  ;;  %1852 = vmatprep.mubr.f32.mxu1 %v782_v46 }
 0x2e8   : > { %1997 = vmatprep.subr.bf16.mxu1 %v1996_v49 }
 0x2ea   : > { %1853 = vmatmul.mubr.f32.gmra.mrb[6].mxu1 %v783_v3 }
 0x2eb   : > { %1859 = vmatprep.mubr.f32.mxu1 %v780_v42 }
 0x2ee   : > { %1860 = vmatmul.mubr.f32.vlgmr.msra.gmra.mrb[8].mxu1 %v781_v57 }
 0x2ef   : > { %1999 = vmatpush3.bf16.msra.mxu1 %v1996_v49  ;;  %1862 = vmatprep.mubr.f32.mxu1 %v782_v46 }
 0x2f0   : > { %2001 = vmatprep.subr.bf16.mxu1 %v2862_v59 }
 0x2f2   : > { %1863 = vmatmul.mubr.f32.gmra.mrb[10].mxu1 %v783_v3 }
 0x3b1   : > { %v1841_v16 = vpop.f32.mrb[0].mxu1 }
 0x3b2   : > { %v850_v22 = vpop.f32.mrb[1].mxu1  ;;  %v1043_v23 = vsel %vm1039_vm1, %v1841_v16, -inf }
 0x3b3   : > { %1044 = vmax.xlane.f32.xlu1 %v1043_v23  ;;  %v1040_v24 = vsel %vm1039_vm1, %v850_v22, -inf }
 0x3b4   : > { %1041 = vmax.xlane.f32.xlu0 %v1040_v24 }
 0x3b5   : > { %v1844_v25 = vpop.f32.mrb[2].mxu1 }
 0x3b6   : > { %v860_v26 = vpop.f32.mrb[3].mxu1  ;;  %v1049_v0 = vsel %vm1039_vm1, %v1844_v25, -inf }
 0x3b7   : > { %1050 = vmax.xlane.f32.xlu1 %v1049_v0  ;;  %v1046_v4 = vsel %vm1039_vm1, %v860_v26, -inf }
 0x3b8   : > { %1047 = vmax.xlane.f32.xlu0 %v1046_v4 }
 0x3b9   : > { %v1851_v21 = vpop.f32.mrb[4].mxu1 }
 0x3ba   : > { %v935_v27 = vpop.f32.mrb[5].mxu1  ;;  %v1055_v19 = vsel %vm1039_vm1, %v1851_v21, -inf }
 0x3bb   : > { %1056 = vmax.xlane.f32.xlu1 %v1055_v19  ;;  %v1052_v1 = vsel %vm1039_vm1, %v935_v27, -inf }
 0x3bc   : > { %1053 = vmax.xlane.f32.xlu0 %v1052_v1 }
 0x3bd   : > { %v1854_v2 = vpop.f32.mrb[6].mxu1 }
 0x3be   : > { %v945_v28 = vpop.f32.mrb[7].mxu1  ;;  %v1061_v31 = vsel %vm1039_vm1, %v1854_v2, -inf }
 0x3bf   : > { %1062 = vmax.xlane.f32.xlu1 %v1061_v31  ;;  %v1058_v32 = vsel %vm1039_vm1, %v945_v28, -inf }
 0x3c0   : > { %1059 = vmax.xlane.f32.xlu0 %v1058_v32 }
 0x3c1   : > { %v1861_v33 = vpop.f32.mrb[8].mxu1 }
 0x3c2   : > { %v1020_v30 = vpop.f32.mrb[9].mxu1  ;;  %v1067_v29 = vsel %vm1039_vm1, %v1861_v33, -inf }
 0x3c3   : > { %1068 = vmax.xlane.f32.xlu1 %v1067_v29  ;;  %v1064_v34 = vsel %vm1039_vm1, %v1020_v30, -inf }
 0x3c4   : > { %1065 = vmax.xlane.f32.xlu0 %v1064_v34 }
 0x3c5   : > { %v2877_v35 = vpop.f32.mrb[10].mxu1 }
 0x3c6   : > { %v2879_v39 = vpop.f32.mrb[11].mxu1  ;;  %v1073_v5 = vsel %vm1039_vm1, %v2877_v35, -inf }
 0x3c7   : > { %1074 = vmax.xlane.f32.xlu1 %v1073_v5  ;;  %v1070_v6 = vsel %vm1039_vm1, %v2879_v39, -inf  ;;  %v1490_v5 = vld [vmem:[#allocation10 + $0x10] sm:$0xff] }
 0x3c8   : > { %1071 = vmax.xlane.f32.xlu0 %v1070_v6  ;;  %v2429_v6 = vmov 0.0|0.0  }
 0x3c9   : > { %2008 = vmatprep.subr.bf16.mxu0 %v2429_v6 }
 0x440   : > { %v1045_v36 = vpop.xlane.xlu1 %1044 }
 0x441   : > { %v1077_v37 = vsub.f32 %v1841_v16, %v1045_v36  ;;  %v1042_v38 = vpop.xlane.xlu0 %1041 }
 0x442   : > { %v1076_v42 = vsub.f32 %v850_v22, %v1042_v38 }
 0x443   : > { %v1090_v10 = vmul.f32 1.442695, %v1077_v37  ;;  %v1491_v37 = vld [vmem:[#allocation10 + $0x18] sm:$0xff] }
 0x444   : > { %v1088_v41 = vmul.f32 1.442695, %v1076_v42  ;;  %v1051_v11 = vpop.xlane.xlu1 %1050  ;;  %v2012_v38 = vpack.c.bf16 %v1491_v37, %v1490_v5  ;;  %v1492_v42 = vld [vmem:[#allocation10 + $0x20] sm:$0xff] }
 0x445   : > { %2154 = vpow2.f32 %v1090_v10  ;;  %v1079_v40 = vsub.f32 %v1844_v25, %v1051_v11  ;;  %v1048_v43 = vpop.xlane.xlu0 %1047  ;;  %v1493_v10 = vld [vmem:[#allocation10 + $0x28] sm:$0xff]  ;;  %v1494_v11 = vld [vmem:[#allocation10 + $0x30] sm:$0xff] }
 0x446   : > { %2156 = vpow2.f32 %v1088_v41  ;;  %v1078_v44 = vsub.f32 %v860_v26, %v1048_v43  ;;  %v2015_v41 = vpack.c.bf16 %v1493_v10, %v1492_v42 }
 0x447   : > { %v1094_v45 = vmul.f32 1.442695, %v1079_v40  ;;  %v1495_v40 = vld [vmem:[#allocation10 + $0x38] sm:$0xff] }
 0x448   : > { %v1092_v18 = vmul.f32 1.442695, %v1078_v44  ;;  %v1057_v20 = vpop.xlane.xlu1 %1056  ;;  %v2018_v43 = vpack.c.bf16 %v1495_v40, %v1494_v11  ;;  %v1496_v44 = vld [vmem:[#allocation10 + $0x40] sm:$0xff] }
 0x449   : > { %v1081_v15 = vsub.f32 %v1851_v21, %v1057_v20  ;;  %v1054_v47 = vpop.xlane.xlu0 %1053  ;;  %v1498_v20 = vld [vmem:[#allocation10 + $0x50] sm:$0xff] }
 0x44a   : > { %2158 = vpow2.f32 %v1092_v18  ;;  %v1080_v48 = vsub.f32 %v935_v27, %v1054_v47 }
 0x44b   : > { %2160 = vpow2.f32 %v1094_v45  ;;  %v1098_v49 = vmul.f32 1.442695, %v1081_v15  ;;  %v1497_v45 = vld [vmem:[#allocation10 + $0x48] sm:$0xff]  ;;  %v1499_v15 = vld [vmem:[#allocation10 + $0x58] sm:$0xff] }
 0x44c   : > { %v1096_v50 = vmul.f32 1.442695, %v1080_v48  ;;  %v1063_v51 = vpop.xlane.xlu1 %1062  ;;  %v2021_v18 = vpack.c.bf16 %v1497_v45, %v1496_v44  ;;  %v2024_v47 = vpack.c.bf16 %v1499_v15, %v1498_v20  ;;  %v1500_v48 = vld [vmem:[#allocation10 + $0x60] sm:$0xff] }
 0x44d   : > { %2162 = vpow2.f32 %v1098_v49  ;;  %v1083_v52 = vsub.f32 %v1854_v2, %v1063_v51  ;;  %v1060_v53 = vpop.xlane.xlu0 %1059  ;;  %v1501_v49 = vld [vmem:[#allocation10 + $0x68] sm:$0xff]  ;;  %v1502_v51 = vld [vmem:[#allocation10 + $0x70] sm:$0xff] }
 0x44e   : > { %2164 = vpow2.f32 %v1096_v50  ;;  %v1082_v54 = vsub.f32 %v945_v28, %v1060_v53  ;;  %v2027_v50 = vpack.c.bf16 %v1501_v49, %v1500_v48 }
 0x44f   : > { %v2155_v14 = vpop.eup %2154  ;;  %v1102_v55 = vmul.f32 1.442695, %v1083_v52  ;;  %v1503_v52 = vld [vmem:[#allocation10 + $0x78] sm:$0xff] }
 0x450   : > { %v2157_v56 = vpop.eup %2156  ;;  %v1100_v57 = vmul.f32 1.442695, %v1082_v54  ;;  %v1069_v58 = vpop.xlane.xlu1 %1068  ;;  %v1115_v46 = vsel %vm1039_vm1, %v2155_v14, 0.0  ;;  %v2030_v53 = vpack.c.bf16 %v1503_v52, %v1502_v51  ;;  %v2431_v54 = vmov 0.0  }
 0x451   : > { %2166 = vpow2.f32 %v1102_v55  ;;  %v1085_v60 = vsub.f32 %v1861_v33, %v1069_v58  ;;  %1116 = vadd.xlane.f32.xlu0 %v1115_v46  ;;  %1869 = vmatprep.mubr.msk.f32.mxu1 %vm1039_vm1, %v2157_v56  ;;  %v1066_v61 = vpop.xlane.xlu0 %1065  ;;  %v1112_v62 = vsel %vm1039_vm1, %v2157_v56, 0.0 }
 0x452   : > { %2168 = vpow2.f32 %v1100_v57  ;;  %v1084_v63 = vsub.f32 %v1020_v30, %v1066_v61  ;;  %1870 = vmatmul.mubr.msk.f32.vlgmr.msra.gmra.mrb[12].mxu1 %vm1039_vm1, %v2155_v14  ;;  %1113 = vadd.xlane.f32.xlu1 %v1112_v62 }
 0x453   : > { %v1106_v3 = vmul.f32 1.442695, %v1085_v60  ;;  %2003 = vmatpush3.bf16.msra.mxu1 %v2862_v59  ;;  %1927 = vmatprep.mubr.msk.f32.mxu0 %vm2430_vm2, %v2431_v54 }
 0x454   : > { %v2159_v7 = vpop.eup %2158  ;;  %v1104_v8 = vmul.f32 1.442695, %v1084_v63  ;;  %2005 = vmatprep.subr.bf16.mxu1 %v2864_v13  ;;  %v1075_v9 = vpop.xlane.xlu1 %1074 }
 0x455   : > { %v2161_v17 = vpop.eup %2160  ;;  %2170 = vpow2.f32 %v1106_v3  ;;  %v1087_v12 = vsub.f32 %v2877_v35, %v1075_v9  ;;  %1872 = vmatprep.mubr.msk.f32.mxu1 %vm1039_vm1, %v2159_v7  ;;  %v1072_v16 = vpop.xlane.xlu0 %1071  ;;  %v1118_v22 = vsel %vm1039_vm1, %v2159_v7, 0.0  ;;  %v1488_v35 = vld [vmem:[#allocation10] sm:$0xff] }
 0x456   : > { %2172 = vpow2.f32 %v1104_v8  ;;  %v1086_v23 = vsub.f32 %v2879_v39, %v1072_v16  ;;  %1873 = vmatmul.mubr.msk.f32.gmra.mrb[14].mxu1 %vm1039_vm1, %v2161_v17  ;;  %1119 = vadd.xlane.f32.xlu0 %v1118_v22  ;;  %v1121_v30 = vsel %vm1039_vm1, %v2161_v17, 0.0  ;;  %v1489_v39 = vld [vmem:[#allocation10 + $0x8] sm:$0xff]  ;;  %v1463_v16 = vld [vmem:[#allocation7] sm:$0xff] }
 0x457   : > { %v2163_v59 = vpop.eup %2162  ;;  %v1110_v24 = vmul.f32 1.442695, %v1087_v12  ;;  %v2009_v36 = vpack.c.bf16 %v1489_v39, %v1488_v35  ;;  %v1464_v8 = vld [vmem:[#allocation7 + $0x8] sm:$0xff] }
 0x458   : > { %v2165_v25 = vpop.eup %2164  ;;  %v1108_v26 = vmul.f32 1.442695, %v1086_v23  ;;  %v1127_v0 = vsel %vm1039_vm1, %v2163_v59, 0.0 }
 0x459   : > { %1128 = vadd.xlane.f32.xlu1 %v1127_v0  ;;  %1879 = vmatprep.mubr.msk.f32.mxu1 %vm1039_vm1, %v2165_v25  ;;  %v1124_v4 = vsel %vm1039_vm1, %v2165_v25, 0.0 }
 0x45a   : > { %2174 = vpow2.f32 %v1108_v26  ;;  %1880 = vmatmul.mubr.msk.f32.vlgmr.msra.gmra.mrb[16].mxu1 %vm1039_vm1, %v2163_v59  ;;  %1125 = vadd.xlane.f32.xlu0 %v1124_v4 }
 0x45b   : > { %v2167_v21 = vpop.eup %2166  ;;  %2176 = vpow2.f32 %v1110_v24  ;;  %2007 = vmatpush3.bf16.msra.mxu1 %v2864_v13  ;;  %2010 = vmatpush3.bf16.msra.mxu0 %v2009_v36 }
 0x45c   : > { %v2169_v27 = vpop.eup %2168  ;;  %v1133_v19 = vsel %vm1039_vm1, %v2167_v21, 0.0  ;;  %2032 = vmatprep.subr.bf16.mxu1 %v2429_v6  ;;  %2011 = vmatprep.subr.bf16.mxu0 %v2429_v6 }
 0x45d   : > { %1134 = vadd.xlane.f32.xlu1 %v1133_v19  ;;  %1882 = vmatprep.mubr.msk.f32.mxu1 %vm1039_vm1, %v2169_v27  ;;  %v1130_v1 = vsel %vm1039_vm1, %v2169_v27, 0.0 }
 0x45e   : > { %1883 = vmatmul.mubr.msk.f32.gmra.mrb[18].mxu1 %vm1039_vm1, %v2167_v21  ;;  %1131 = vadd.xlane.f32.xlu0 %v1130_v1  ;;  %v1465_v21 = vld [vmem:[#allocation7 + $0x10] sm:$0xff] }
 0x45f   : > { %v2171_v2 = vpop.eup %2170  ;;  %2013 = vmatpush3.bf16.msra.mxu0 %v2012_v38 }
 0x460   : > { %v2173_v28 = vpop.eup %2172  ;;  %v1139_v31 = vsel %vm1039_vm1, %v2171_v2, 0.0  ;;  %2014 = vmatprep.subr.bf16.mxu0 %v2429_v6 }
 0x461   : > { %1140 = vadd.xlane.f32.xlu1 %v1139_v31  ;;  %1889 = vmatprep.mubr.msk.f32.mxu1 %vm1039_vm1, %v2173_v28  ;;  %v1136_v13 = vsel %vm1039_vm1, %v2173_v28, 0.0 }
 0x462   : > { %1890 = vmatmul.mubr.msk.f32.vlgmr.msra.gmra.mrb[20].mxu1 %vm1039_vm1, %v2171_v2  ;;  %1137 = vadd.xlane.f32.xlu0 %v1136_v13  ;;  %v1466_v2 = vld [vmem:[#allocation7 + $0x18] sm:$0xff] }
 0x463   : > { %2040 = vmatpush3.bf16.msra.mxu1 %v2009_v36  ;;  %2016 = vmatpush3.bf16.msra.mxu0 %v2015_v41 }
 0x464   : > { %v2175_v32 = vpop.eup %2174  ;;  %2033 = vmatprep.subr.bf16.mxu1 %v2429_v6  ;;  %2017 = vmatprep.subr.bf16.mxu0 %v2429_v6 }
 0x465   : > { %v2177_v33 = vpop.eup %2176  ;;  %1892 = vmatprep.mubr.msk.f32.mxu1 %vm1039_vm1, %v2175_v32  ;;  %v1142_v29 = vsel %vm1039_vm1, %v2175_v32, 0.0 }
 0x466   : > { %1122 = vadd.xlane.f32.xlu0 %v1121_v30  ;;  %1893 = vmatmul.mubr.msk.f32.gmra.mrb[22].mxu1 %vm1039_vm1, %v2177_v33  ;;  %v1145_v34 = vsel %vm1039_vm1, %v2177_v33, 0.0 }
 0x467   : > { %1143 = vadd.xlane.f32.xlu1 %v1142_v29  ;;  %2041 = vmatpush3.bf16.msra.mxu1 %v2012_v38 }
 0x468   : > { %2034 = vmatprep.subr.bf16.mxu1 %v2429_v6  ;;  %2019 = vmatpush3.bf16.msra.mxu0 %v2018_v43 }
 0x469   : > { %2020 = vmatprep.subr.bf16.mxu0 %v2429_v6  ;;  %1930 = vmatprep.mubr.msk.f32.mxu1 %vm2430_vm2, %v2431_v54 }
 0x46b   : > { %1146 = vadd.xlane.f32.xlu1 %v1145_v34  ;;  %2042 = vmatpush3.bf16.msra.mxu1 %v2015_v41 }
 0x46c   : > { %2035 = vmatprep.subr.bf16.mxu1 %v2429_v6  ;;  %2022 = vmatpush3.bf16.msra.mxu0 %v2021_v18 }
 0x46d   : > { %2023 = vmatprep.subr.bf16.mxu0 %v2429_v6 }
 0x46f   : > { %2043 = vmatpush3.bf16.msra.mxu1 %v2018_v43 }
 0x470   : > { %2036 = vmatprep.subr.bf16.mxu1 %v2429_v6  ;;  %2025 = vmatpush3.bf16.msra.mxu0 %v2024_v47 }
 0x471   : > { %2026 = vmatprep.subr.bf16.mxu0 %v2429_v6 }
 0x473   : > { %2044 = vmatpush3.bf16.msra.mxu1 %v2021_v18 }
 0x474   : > { %2037 = vmatprep.subr.bf16.mxu1 %v2429_v6  ;;  %2028 = vmatpush3.bf16.msra.mxu0 %v2027_v50 }
 0x475   : > { %2029 = vmatprep.subr.bf16.mxu0 %v2429_v6 }
 0x477   : > { %2045 = vmatpush3.bf16.msra.mxu1 %v2024_v47 }
 0x478   : > { %2038 = vmatprep.subr.bf16.mxu1 %v2429_v6  ;;  %2031 = vmatpush3.bf16.msra.mxu0 %v2030_v53 }
 0x47b   : > { %2046 = vmatpush3.bf16.msra.mxu1 %v2027_v50 }
 0x47c   : > { %2039 = vmatprep.subr.bf16.mxu1 %v2429_v6 }
 0x47f   : > { %2047 = vmatpush3.bf16.msra.mxu1 %v2030_v53 }
 0x4de   : > { %v1117_v14 = vpop.xlane.xlu0 %1116 }
 0x4df   : > { %v1114_v57 = vpop.xlane.xlu1 %1113  ;;  %2178 = vrcp.f32 %v1117_v14 }
 0x4e0   : > { %2180 = vrcp.f32 %v1114_v57 }
 0x4e3   : > { %v1120_v55 = vpop.xlane.xlu0 %1119 }
 0x4e4   : > { %2182 = vrcp.f32 %v1120_v55 }
 0x4e6   : > { %v1129_v46 = vpop.xlane.xlu1 %1128 }
 0x4e7   : > { %v1126_v56 = vpop.xlane.xlu0 %1125 }
 0x4e9   : > { %v2179_v3 = vpop.eup %2178 }
 0x4ea   : > { %v1135_v61 = vpop.xlane.xlu1 %1134  ;;  %v2181_v9 = vpop.eup %2180 }
 0x4eb   : > { %v1132_v58 = vpop.xlane.xlu0 %1131 }
 0x4ee   : > { %v1141_v63 = vpop.xlane.xlu1 %1140  ;;  %v2183_v24 = vpop.eup %2182 }
 0x4ef   : > { %v1138_v60 = vpop.xlane.xlu0 %1137 }
 0x4f3   : > { %v1123_v62 = vpop.xlane.xlu0 %1122 }
 0x4f4   : > { %2184 = vrcp.f32 %v1123_v62  ;;  %v1144_v22 = vpop.xlane.xlu1 %1143 }
 0x4f5   : > { %2186 = vrcp.f32 %v1129_v46 }
 0x4f6   : > { %2188 = vrcp.f32 %v1126_v56 }
 0x4f7   : > { %2190 = vrcp.f32 %v1135_v61 }
 0x4f8   : > { %2192 = vrcp.f32 %v1132_v58  ;;  %v1147_v31 = vpop.xlane.xlu1 %1146 }
 0x4f9   : > { %2194 = vrcp.f32 %v1141_v63 }
 0x4fa   : > { %2196 = vrcp.f32 %v1138_v60 }
 0x4fb   : > { %2198 = vrcp.f32 %v1144_v22 }
 0x4fc   : > { %2200 = vrcp.f32 %v1147_v31 }
 0x4fe   : > { %v2185_v0 = vpop.eup %2184 }
 0x4ff   : > { %v2187_v28 = vpop.eup %2186 }
 0x500   : > { %v2189_v33 = vpop.eup %2188 }
 0x501   : > { %v2191_v6 = vpop.eup %2190 }
 0x502   : > { %v2193_v42 = vpop.eup %2192 }
 0x503   : > { %v2195_v43 = vpop.eup %2194 }
 0x504   : > { %v2197_v18 = vpop.eup %2196 }
 0x505   : > { %v2199_v51 = vpop.eup %2198 }
 0x506   : > { %v2201_v55 = vpop.eup %2200 }
 0x525   : > { %v1871_v7 = vpop.f32.mrb[12].mxu1 }
 0x526   : > { %v1452_v17 = vmul.f32 %v2179_v3, %v1871_v7  ;;  %v1238_v12 = vpop.f32.mrb[13].mxu1  ;;  %v1764_v3 = vld [vmem:[%s3036_s25] ss:$0 sm:$0xff] }
 0x527   : > { %v1451_v23 = vmul.f32 %v2181_v9, %v1238_v12 }
 0x528   : > { %v1468_v59 = vmul.f32 %v1464_v8, %v1452_v17 }
 0x529   : > { %v1467_v25 = vmul.f32 %v1463_v16, %v1451_v23  ;;  %v1874_v26 = vpop.f32.mrb[14].mxu1 }
 0x52a   : > { %v1248_v4 = vpop.f32.mrb[15].mxu1  ;;  %v1454_v19 = vmul.f32 %v2185_v0, %v1874_v26 }
 0x52b   : > { %v1479_v27 = vadd.f32 %v1468_v59, %v1467_v25  ;;  %v1453_v1 = vmul.f32 %v2183_v24, %v1248_v4 }
 0x52c   : > { %v1470_v34 = vmul.f32 %v1466_v2, %v1454_v19 }
 0x52d   : > { %v1469_v13 = vmul.f32 %v1465_v21, %v1453_v1  ;;  %v1881_v32 = vpop.f32.mrb[16].mxu1 }
 0x52e   : > { %v1456_v30 = vmul.f32 %v2187_v28, %v1881_v32  ;;  %v1335_v29 = vpop.f32.mrb[17].mxu1 }
 0x52f   : > { %v1482_v35 = vadd.f32 %v1479_v27, %v1469_v13  ;;  %v1455_v39 = vmul.f32 %v2189_v33, %v1335_v29 }
 0x530   : > { %v1472_v5 = vmul.f32 %v1464_v8, %v1456_v30 }
 0x531   : > { %v1485_v36 = vadd.f32 %v1482_v35, %v1470_v34  ;;  %v1471_v37 = vmul.f32 %v1463_v16, %v1455_v39  ;;  %v1884_v38 = vpop.f32.mrb[18].mxu1 }
 0x532   : > { %v1345_v10 = vpop.f32.mrb[19].mxu1  ;;  %v1458_v11 = vmul.f32 %v2191_v6, %v1884_v38 }
 0x533   : > { %v1480_v41 = vadd.f32 %v1472_v5, %v1471_v37  ;;  %v1457_v40 = vmul.f32 %v2193_v42, %v1345_v10  ;;  %1928 = vmatmul.mubr.f32.vlgmr.msra.gmra.mrb[12].mxu0 %v1485_v36 }
 0x534   : > { %v1474_v47 = vmul.f32 %v1466_v2, %v1458_v11 }
 0x535   : > { %v1473_v44 = vmul.f32 %v1465_v21, %v1457_v40  ;;  %v1891_v45 = vpop.f32.mrb[20].mxu1 }
 0x536   : > { %v1460_v20 = vmul.f32 %v2195_v43, %v1891_v45  ;;  %v1432_v15 = vpop.f32.mrb[21].mxu1 }
 0x537   : > { %v1483_v48 = vadd.f32 %v1480_v41, %v1473_v44  ;;  %v1459_v49 = vmul.f32 %v2197_v18, %v1432_v15 }
 0x538   : > { %v1476_v50 = vmul.f32 %v1464_v8, %v1460_v20 }
 0x539   : > { %v1486_v52 = vadd.f32 %v1483_v48, %v1474_v47  ;;  %v1475_v53 = vmul.f32 %v1463_v16, %v1459_v49  ;;  %v1894_v14 = vpop.f32.mrb[22].mxu1 }
 0x53a   : > { %v1442_v56 = vpop.f32.mrb[23].mxu1  ;;  %v1462_v58 = vmul.f32 %v2201_v55, %v1894_v14 }
 0x53b   : > { %v1481_v57 = vadd.f32 %v1476_v50, %v1475_v53  ;;  %v1461_v46 = vmul.f32 %v2199_v51, %v1442_v56  ;;  %1931 = vmatmul.mubr.f32.vlgmr.msra.gmra.mrb[24].mxu1 %v1486_v52 }
 0x53c   : > { %1933 = vmatprep.mubr.msk.f32.mxu1 %vm2430_vm2, %v2431_v54  ;;  %v1478_v61 = vmul.f32 %v1466_v2, %v1462_v58 }
 0x53d   : > { %v1477_v60 = vmul.f32 %v1465_v21, %v1461_v46 }
 0x53f   : > { %v1484_v62 = vadd.f32 %v1481_v57, %v1477_v60 }
 0x541   : > { %v1487_v63 = vadd.f32 %v1484_v62, %v1478_v61 }
 0x543   : > { %1934 = vmatmul.mubr.f32.gmra.mrb[26].mxu1 %v1487_v63 }
 0x606   : > { %v1577_v7 = vpop.f32.mrb[12].mxu0 }
 0x607   : > { %v1578_v8 = vadd.f32 %v1764_v3, %v1577_v7  ;;  %v1929_v9 = vpop.f32.mrb[13].mxu0 }
 0x609   : > { %1591 = vst [vmem:[%s418_s24] sm:$0xff] %v1578_v8 }
 0x60e   : > { %v1582_v17 = vpop.f32.mrb[24].mxu1 }
 0x60f   : > { %v1583_v12 = vadd.f32 %v1764_v3, %v1582_v17  ;;  %v1932_v16 = vpop.f32.mrb[25].mxu1 }
 0x611   : > { %1592 = vst [vmem:[%s418_s24 + $0x8] sm:$0xff] %v1583_v12 }
 0x613   : > { %1601 = sbr.rel (!%p3038_p1) target bundleno = 1591 (0x637), region = 80 }
 0x616   : > { %v1587_v54 = vpop.f32.mrb[26].mxu1 }
 0x617   : > { %v1588_v22 = vadd.f32 %v1764_v3, %v1587_v54  ;;  %v1935_v23 = vpop.f32.mrb[27].mxu1 }
 0x619   : > { %1593 = vst [vmem:[%s418_s24 + $0x10] sm:$0xff] %v1588_v22 }
 0x61a   : > { %s3051_s27 = smov (!%p1604_p3, %s1603_s27), 3 }
 0x61b   : > { %s2928_s14 = sshll.u32 %s3051_s27, 7 }
 0x61c   : > { %s1608_s30 = ssub.s32 384, %s2928_s14 }
 0x61d   : > { %1609 = vsyncadd %s1595_s28, %s1608_s30  ;;  %p1766_p5 = scmp.ne.s32.totalorder %s2928_s14, 0  ;;  %s1778_s9 = smul.u32 384, %s2506_s13 }
 0x61e   : > { %s1614_s22 = sshll.u32 %s418_s24, 4  ;;  %s3039_s8 = sld [smem:[#allocation24_spill]]  ;;  %s2940_s22 = int_to_ptr.vmem [resolvable:$true] %s1614_s22 }
 0x61f   : > { %s2342_s18 = scalar_lea.vmem %s2940_s22, %s2928_s14  ;;  %s2432_s21 = smov [#allocation11]  }
 0x620   : > { %p2343_p6 = scmp.ne.s32.totalorder %s2940_s22, %s2342_s18  ;;  %s2346_s15 = sshll.u32 %s2432_s21, 4  ;;  %s2347_s15 = int_to_ptr.vmem [resolvable:$false] %s2346_s15 }
 0x621   : > { %s2348_s13 = scalar_lea.vmem %s2347_s15, 768  ;;  %p2349_p0 = scmp.lt.s32.totalorder %s2940_s22, %s2347_s15 }
 0x622   : > { %p2344_p11 = pnand %p2343_p6, %p1766_p5  ;;  %p2350_p12 = scmp.lt.s32.totalorder %s2348_s13, %s2342_s18 }
 0x624   : > { %s2938_s1 = scalar_lea.hbm %s3039_s8, %s1778_s9  ;;  %p2345_p13 = pneg %p2344_p11 }
 0x625   : > { %p2351_p7 = por %p2350_p12, %p2349_p0 }
 0x627   : > { %p2352_p2 = pnand %p2351_p7, %p2345_p13 }
 0x629   : > { %2355 = shalt.err (!%p2352_p2)
}
 0x62a   : > { %s2356_s17 = scalar_lea.hbm %s2938_s1, %s2928_s14  ;;  %s2360_s25 = scalar_lea.hbm %s3039_s8, 640 }
 0x62b   : > { %p2357_p8 = scmp.ne.s32.totalorder %s2938_s1, %s2356_s17  ;;  %p2361_p1 = scmp.lt.u32.totalorder %s2938_s1, %s3039_s8 }
 0x62c   : > { %p2362_p3 = scmp.lt.u32.totalorder %s2360_s25, %s2356_s17  ;;  %p2364_p11 = scmp.lt.u32.totalorder %s2356_s17, %s2938_s1 }
 0x62d   : > { %p2358_p9 = pnand %p2357_p8, %p1766_p5 }
 0x62e   : > { %p2363_p6 = por %p2362_p3, %p2361_p1 }
 0x62f   : > { %p2359_p10 = pneg %p2358_p9 }
 0x630   : > { %p2365_p13 = por %p2364_p11, %p2363_p6 }
 0x632   : > { %p2366_p0 = pnand %p2365_p13, %p2359_p10 }
 0x634   : > { %2369 = shalt.err (!%p2366_p0)
}
 0x635   : > { %s2433_s6 = smov 128   ;;  %s2434_s27 = smov 8  }
 0x636   : > { %1620 = dma.vmem_to_hbm [thread:$0]  (%p1766_p5), %s2940_s22, %s2928_s14, %s2938_s1, %s1595_s28, %s2433_s6, %s2433_s6, %s2434_s27  }
 0x637 PF: > { %s3040_s30 = sld [smem:[#allocation16_spill]]  ;;  %s3041_s9 = sld [smem:[#allocation20_spill]] }
 0x63d   : > { %s1629_s20 = sand.u32 1, %s3040_s30   ;;  %p3042_p12 = scmp.ne.s32.totalorder %s3041_s9, 0 }
 0x63e   : > { %s1630_s23 = scalar_lea.sflag [#allocation4], %s1629_s20 }
 0x63f   : > { %p2083_p7 = pnand %p1731_p4, %p3042_p12 }
 0x641   : > { %2399 = dma.done.wait (!%p2083_p7), %s1630_s23, 384  }
 0x642   : > { %2401 = vsyncadd (!%p2083_p7), %s1630_s23, 4294966912  ;;  %s3043_s12 = sld [smem:[#allocation17_spill]]  ;;  %s3044_s18 = sld [smem:[#allocation18_spill]] }
 0x643   : > { %s3045_s30 = smov %s2408_s10  ;;  %s3046_s10 = smov %s2412_s11 }
 0x648   : > { %p24_p2 = scmp.ge.s32.totalorder %s3043_s12, 4   ;;  %s3047_s11 = smov %s3044_s18 }
 0x64a   :  { %26 = sbr.rel (!%p24_p2) target bundleno = 12 (0xc), region = 117 }
 0x651   :  { %1635 = vsyncpa [#allocation3], 1 }
 0x652   :  { %1637 = vsyncpa [#allocation3 + $0x1], 1 }
 0x653   :  { %1638 = vsyncpa [#allocation6], 1 }
 0x654   :  { %1639 = vsyncpa [#allocation9], 1 }
 0x655   :  { %1640 = vsyncpa [#allocation4], 1 }
 0x656   :  { %1642 = vsyncpa [#allocation4 + $0x1], 1 }

</bundles_post_ra>
